<compile_context>
chip_gen: v7x
topology: tpu7x:2x2x1
jax: 0.10.0
libtpu: 0.0.40
codegen_flags: <defaults>
</compile_context>

<pallas_src>
import functools

import jax
import jax.numpy as jnp
from jax.experimental import pallas as pl
from jax.experimental.pallas import tpu as pltpu

LN_EPS = 1e-5          # PyTorch nn.LayerNorm default
_MIB = 1 << 20
_SQRT_HALF = 0.7071067811865476


def _gelu(x):
    # PyTorch nn.GELU() default = exact (erf-based) GELU.  erf is evaluated in f32
    # (VPU polynomial); the surrounding elementwise math stays in x.dtype so the big
    # (2N, TB*D) / (TB*N, D) tensors can run in bf16 on v6e/v7x.
    erf = jax.lax.erf(x.astype(jnp.float32) * _SQRT_HALF).astype(x.dtype)
    return x * jnp.asarray(0.5, x.dtype) * (jnp.asarray(1.0, x.dtype) + erf)


def _layernorm(x, gamma, beta):
    mu = jnp.mean(x, axis=-1, keepdims=True)
    var = jnp.mean((x - mu) ** 2, axis=-1, keepdims=True)
    return (x - mu) * jax.lax.rsqrt(var + LN_EPS) * gamma + beta


def mixer_block_kernel(
    x_ref,                                   # (N, TB*D) f32 : token-major view of the batch block
    lng_t_ref, lnb_t_ref,                    # (N, 1)  f32
    w1t_ref, b1t_ref,                        # (2N, N) bf16, (2N, 1) f32
    w2t_ref, b2t_ref,                        # (N, 2N) bf16, (N, 1)  f32
    lng_c_ref, lnb_c_ref,                    # (1, D)  f32
    w1c_ref, b1c_ref,                        # (2, D, D) bf16, (2, 1, D) f32   (channel hidden halves)
    w2c_ref, b2c_ref,                        # (2, D, D) bf16, (1, D)   f32
    o_ref,                                   # (TB*N, D) : output block, also used as staging buffer
    *, gelu_dtype,
):
    f32, bf16 = jnp.float32, jnp.bfloat16
    n = x_ref.shape[0]
    tbn, d = o_ref.shape
    tb = tbn // n

    # -------- token mixing: LayerNorm + MLP over the patch axis N, folded over TB*D lanes -----
    x = x_ref[...].astype(f32)                              # f32 LN stats / residual
    mu = jnp.mean(x, axis=0, keepdims=True)
    var = jnp.mean((x - mu) ** 2, axis=0, keepdims=True)
    h = (x - mu) * jax.lax.rsqrt(var + LN_EPS) * lng_t_ref[...] + lnb_t_ref[...]       # (N, TB*D)
    h = jnp.dot(w1t_ref[...], h.astype(bf16), preferred_element_type=f32)              # (2N, TB*D)
    h = _gelu(h.astype(gelu_dtype) + b1t_ref[...].astype(gelu_dtype))
    h = jnp.dot(w2t_ref[...], h.astype(bf16), preferred_element_type=f32) + b2t_ref[...]  # (N, TB*D)
    y = x + h                                               # residual, (N, TB*D)

    # Stage y into the (TB*N, D) channel-mix layout: one contiguous row block per batch
    # element (static lane slice -> contiguous sublane store; no relayout reshape, no concat).
    for b in range(tb):                                     # static, tiny: data movement only
        o_ref[pl.ds(b * n, n), :] = y[:, b * d:(b + 1) * d]
    y = o_ref[...]                                          # (TB*N, D) f32

    # -------- channel mixing: LayerNorm + MLP over D, folded over the whole batch block -------
    mu = jnp.mean(y, axis=-1, keepdims=True)
    var = jnp.mean((y - mu) ** 2, axis=-1, keepdims=True)
    g = (y - mu) * jax.lax.rsqrt(var + LN_EPS) * lng_c_ref[...] + lnb_c_ref[...]
    g = g.astype(bf16)

    # Hidden dim 2D split into two D halves: halves the largest live f32 intermediate
    # (the (TB*N, 2D) tensor) at no extra MXU cost; exact up to f32 summation order.
    h_c = None
    for half in range(2):                                   # static
        t = jnp.dot(g, w1c_ref[half], preferred_element_type=f32)                      # (TB*N, D)
        t = _gelu(t.astype(gelu_dtype) + b1c_ref[half].astype(gelu_dtype))
        t = jnp.dot(t.astype(bf16), w2c_ref[half], preferred_element_type=f32)         # (TB*N, D)
        h_c = t if h_c is None else h_c + t

    o_ref[...] = (y + h_c + b2c_ref[...]).astype(o_ref.dtype)                          # residual


def _vmem_bytes_estimate(tb, n, d, weight_buffers=2):
    """Rough upper bound on per-grid-step VMEM residency (bytes)."""
    act = tb * n * d * 4                                  # one (TB*N, D) f32 activation block
    io = 2 * 2 * act                                      # x in + out, double-buffered by the pipeline
    inter = 8 * act                                       # LN temps, token hidden (2x act), y, channel halves
    gemm_w = weight_buffers * 2 * (4 * n * n + 4 * d * d)  # bf16 token + channel GEMM weights
    small = weight_buffers * 4 * (8 * n + 8 * d)          # LN params + biases (f32), generous
    return io + inter + gemm_w + small


def mixer_block(x, params, *, block_b=None, vmem_limit_bytes=None,
                bf16_gelu=True, single_buffer_weights=True):
    """MixerBlock forward.  x: (B, N, D) = (batch, num_patch, dim).

    Numerics note (intentional deviation from PyTorch f32): GEMMs run on the MXU in
    bf16 with f32 accumulation; with bf16_gelu=True the GELU elementwise math also
    runs in bf16 (set False on v5e, which lacks a bf16 VPU, or for tighter numerics).
    LayerNorm statistics, biases and residual adds are always f32.
    """
    B, N, D = x.shape
    H_t = 2 * N

    # ---- block-size selection: grid >= 2 (v7x megacore) and VMEM-bounded (v7x: 64 MiB) ----
    if block_b is None:
        budget = 48 * _MIB
        block_b = 1
        for tb in range(1, B + 1):
            if B % tb:
                continue
            if B > 1 and B // tb < 2:          # keep >= 2 grid steps so both v7x TCs get work
                continue
            if tb * N > 1024:                  # channel-GEMM M-dim target
                continue
            if _vmem_bytes_estimate(tb, N, D) > budget:
                continue
            block_b = tb
    if B % block_b != 0:
        raise ValueError(f"block_b={block_b} must divide batch={B}")
    TB = block_b
    G = B // TB
    TBD, TBN = TB * D, TB * N

    if vmem_limit_bytes is None:
        est = _vmem_bytes_estimate(TB, N, D, weight_buffers=1 if single_buffer_weights else 2)
        # Raise the scoped-VMEM default (16 MiB on v5e / 32 MiB on v6e,v7x) with headroom,
        # but stay within v7x's 64 MiB physical VMEM.  Pass explicitly to override.
        vmem_limit_bytes = int(min(64 * _MIB, max(32 * _MIB, 2 * est)))

    # ---- host-side prep (one-time; fused by XLA) ------------------------------------------
    # x -> (G, N, TB*D): token-mix runs directly in this layout (LN/contraction over the
    # sublane axis N, lanes = TB*D), so the kernel never transposes.
    x_k = x.reshape(G, TB, N, D).transpose(0, 2, 1, 3).reshape(G, N, TBD)

    bf16, f32 = jnp.bfloat16, jnp.float32
    w1t_k = jnp.transpose(params["w1_t"]).astype(bf16)                        # (2N, N)
    w2t_k = jnp.transpose(params["w2_t"]).astype(bf16)                        # (N, 2N)
    w1c_k = params["w1_c"].reshape(D, 2, D).transpose(1, 0, 2).astype(bf16)   # (2, D, D) column halves
    w2c_k = params["w2_c"].reshape(2, D, D).astype(bf16)                      # (2, D, D) row halves
    lng_t_k = params["lng_t"].reshape(N, 1).astype(f32)
    lnb_t_k = params["lnb_t"].reshape(N, 1).astype(f32)
    b1t_k = params["b1_t"].reshape(H_t, 1).astype(f32)
    b2t_k = params["b2_t"].reshape(N, 1).astype(f32)
    lng_c_k = params["lng_c"].reshape(1, D).astype(f32)
    lnb_c_k = params["lnb_c"].reshape(1, D).astype(f32)
    b1c_k = params["b1_c"].reshape(2, 1, D).astype(f32)
    b2c_k = params["b2_c"].reshape(1, D).astype(f32)

    cost = pl.CostEstimate(
        flops=B * (8 * N * N * D + 8 * N * D * D),
        transcendentals=4 * B * N * D,                 # GELU elements (erf may lower to a VPU poly)
        bytes_accessed=2 * B * N * D * 4               # x in + out (f32)
        + (4 * N * N + 4 * D * D) * 2                  # resident bf16 GEMM weights (counted once)
        + (6 * N + 6 * D) * 4,                         # LN params + biases
    )

    kernel = functools.partial(mixer_block_kernel,
                               gelu_dtype=bf16 if bf16_gelu else f32)

    def build_and_run(single_buffer):
        def const_spec(shape):
            idx = lambda g: (0,) * len(shape)
            if single_buffer:
                # Constant index map: block never changes, so a single buffer suffices
                # (halves the resident-weight VMEM footprint vs. default double-buffering).
                return pl.BlockSpec(shape, idx, pipeline_mode=pl.Buffered(1))
            return pl.BlockSpec(shape, idx)

        in_specs = [
            pl.BlockSpec((None, N, TBD), lambda g: (g, 0, 0)),   # x block (gridded over batch)
            const_spec((N, 1)), const_spec((N, 1)),              # token LN gamma / beta
            const_spec((H_t, N)), const_spec((H_t, 1)),          # token W1^T (bf16), b1
            const_spec((N, H_t)), const_spec((N, 1)),            # token W2^T (bf16), b2
            const_spec((1, D)), const_spec((1, D)),              # channel LN gamma / beta
            const_spec((2, D, D)), const_spec((2, 1, D)),        # channel W1 halves (bf16), b1 halves
            const_spec((2, D, D)), const_spec((1, D)),           # channel W2 halves (bf16), b2
        ]
        out = pl.pallas_call(
            kernel,
            out_shape=jax.ShapeDtypeStruct((G, TBN, D), x.dtype),
            grid_spec=pltpu.PrefetchScalarGridSpec(
                num_scalar_prefetch=0,
                grid=(G,),
                in_specs=in_specs,
                out_specs=pl.BlockSpec((None, TBN, D), lambda g: (g, 0, 0)),
            ),
            compiler_params=pltpu.CompilerParams(
                dimension_semantics=("parallel",),
                vmem_limit_bytes=vmem_limit_bytes,
            ),
            cost_estimate=cost,
        )(
            x_k,
            lng_t_k, lnb_t_k, w1t_k, b1t_k, w2t_k, b2t_k,
            lng_c_k, lnb_c_k, w1c_k, b1c_k, w2c_k, b2c_k,
        )
        # (G, TB*N, D) rows are ordered (b_local, n) -> a plain reshape restores (B, N, D).
        return out.reshape(B, N, D)

    if single_buffer_weights:
        try:
            return build_and_run(True)
        except Exception:
            # pipeline_mode=pl.Buffered is not available in every JAX build; the
            # double-buffered fallback is functionally identical.
            pass
    return build_and_run(False)


def init_params(key, dim, num_patch):
    """Deterministic synthetic parameter init (not a checkpoint load)."""
    N, D = num_patch, dim
    ks = jax.random.split(key, 8)
    f32 = jnp.float32
    return {
        # token-mix FeedForward(num_patch): hidden = 2 * num_patch
        "lng_t": jnp.ones((N,), f32),
        "lnb_t": jnp.zeros((N,), f32),
        "w1_t": jax.random.normal(ks[0], (N, 2 * N), f32) * 0.1,
        "b1_t": jax.random.normal(ks[1], (2 * N,), f32) * 0.1,
        "w2_t": jax.random.normal(ks[2], (2 * N, N), f32) * 0.1,
        "b2_t": jax.random.normal(ks[3], (N,), f32) * 0.1,
        # channel-mix FeedForward(dim): hidden = 2 * dim
        "lng_c": jnp.ones((D,), f32),
        "lnb_c": jnp.zeros((D,), f32),
        "w1_c": jax.random.normal(ks[4], (D, 2 * D), f32) * 0.1,
        "b1_c": jax.random.normal(ks[5], (2 * D,), f32) * 0.1,
        "w2_c": jax.random.normal(ks[6], (2 * D, D), f32) * 0.1,
        "b2_c": jax.random.normal(ks[7], (D,), f32) * 0.1,
    }


def mixer_block_ref(x, p, compute_dtype=jnp.float32, gelu_dtype=None):
    """Pure-JAX reference mirroring the PyTorch MixerBlock forward.

    compute_dtype=f32  -> exact reference.
    compute_dtype=bf16 -> mirrors the kernel's MXU numerics (bf16 operands, f32 acc).
    gelu_dtype defaults to compute_dtype (mirrors the kernel's bf16_gelu setting).
    """
    gdt = compute_dtype if gelu_dtype is None else gelu_dtype

    def mm(a, b):
        return jnp.dot(a.astype(compute_dtype), b.astype(compute_dtype),
                       preferred_element_type=jnp.float32)

    def ff(h, w1, b1, w2, b2):
        h = mm(h, w1)
        h = _gelu(h.astype(gdt) + b1.astype(gdt))
        return mm(h, w2) + b2

    s = x
    xt = jnp.transpose(x, (0, 2, 1))                                   # (B, D, N)
    h = _layernorm(xt, p["lng_t"], p["lnb_t"])
    y = jnp.transpose(ff(h, p["w1_t"], p["b1_t"], p["w2_t"], p["b2_t"]), (0, 2, 1)) + s
    h = _layernorm(y, p["lng_c"], p["lnb_c"])
    return y + ff(h, p["w1_c"], p["b1_c"], p["w2_c"], p["b2_c"])


if __name__ == "__main__":
    B, num_patch, dim = 8, 8, 16   # x: (batch, num_patch, dim)

    key = jax.random.PRNGKey(0)
    kx, kp = jax.random.split(key)
    x = jax.random.normal(kx, (B, num_patch, dim), jnp.float32)
    params = init_params(kp, dim=dim, num_patch=num_patch)

    # Default path: auto block_b (=4 -> grid of 2), bf16 GELU, single-buffered weights.
    out = jax.block_until_ready(mixer_block(x, params))
    assert out.shape == (B, num_patch, dim)

    ref_bf16 = mixer_block_ref(x, params, compute_dtype=jnp.bfloat16)   # matches kernel numerics
    assert jnp.allclose(out, ref_bf16, atol=2e-3, rtol=2e-3), "mismatch vs bf16 reference"
    ref_f32 = mixer_block_ref(x, params, compute_dtype=jnp.float32)     # exact reference (loose)
    assert jnp.allclose(out, ref_f32, atol=5e-2, rtol=5e-2), "mismatch vs f32 reference"

    # Second path: explicit block_b, f32 GELU (v5e-style), double-buffered weights.
    out2 = jax.block_until_ready(
        mixer_block(x, params, block_b=2, bf16_gelu=False, single_buffer_weights=False))
    ref2 = mixer_block_ref(x, params, compute_dtype=jnp.bfloat16, gelu_dtype=jnp.float32)
    assert jnp.allclose(out2, ref2, atol=2e-3, rtol=2e-3), "mismatch vs bf16/f32-gelu reference"

    print("KERNEL_OK")
</pallas_src>

<mosaic_0001>
module attributes {stable_mosaic.version = 11 : i64} {
  func.func @mixer_block_kernel(%arg0: i32, %arg1: memref<1x8x64xf32, #tpu.memory_space<vmem>>, %arg2: memref<8x1xf32, #tpu.memory_space<vmem>>, %arg3: memref<8x1xf32, #tpu.memory_space<vmem>>, %arg4: memref<16x8xbf16, #tpu.memory_space<vmem>>, %arg5: memref<16x1xf32, #tpu.memory_space<vmem>>, %arg6: memref<8x16xbf16, #tpu.memory_space<vmem>>, %arg7: memref<8x1xf32, #tpu.memory_space<vmem>>, %arg8: memref<1x16xf32, #tpu.memory_space<vmem>>, %arg9: memref<1x16xf32, #tpu.memory_space<vmem>>, %arg10: memref<2x16x16xbf16, #tpu.memory_space<vmem>>, %arg11: memref<2x1x16xf32, #tpu.memory_space<vmem>>, %arg12: memref<2x16x16xbf16, #tpu.memory_space<vmem>>, %arg13: memref<1x16xf32, #tpu.memory_space<vmem>>, %arg14: memref<1x32x16xf32, #tpu.memory_space<vmem>>) attributes {dimension_semantics = [#tpu.dimension_semantics<parallel>], iteration_bounds = array<i64: 2>, scalar_prefetch = 0 : i64, scratch_operands = 0 : i64, tpu.core_type = #tpu.core_type<tc>, window_params = [{transform_indices = @transform_0, window_bounds = array<i64: 1, 8, 64>}, {pipeline_mode = #tpu.pipeline_mode<synchronous>, transform_indices = @transform_1, window_bounds = array<i64: 8, 1>}, {pipeline_mode = #tpu.pipeline_mode<synchronous>, transform_indices = @transform_2, window_bounds = array<i64: 8, 1>}, {pipeline_mode = #tpu.pipeline_mode<synchronous>, transform_indices = @transform_3, window_bounds = array<i64: 16, 8>}, {pipeline_mode = #tpu.pipeline_mode<synchronous>, transform_indices = @transform_4, window_bounds = array<i64: 16, 1>}, {pipeline_mode = #tpu.pipeline_mode<synchronous>, transform_indices = @transform_5, window_bounds = array<i64: 8, 16>}, {pipeline_mode = #tpu.pipeline_mode<synchronous>, transform_indices = @transform_6, window_bounds = array<i64: 8, 1>}, {pipeline_mode = #tpu.pipeline_mode<synchronous>, transform_indices = @transform_7, window_bounds = array<i64: 1, 16>}, {pipeline_mode = #tpu.pipeline_mode<synchronous>, transform_indices = @transform_8, window_bounds = array<i64: 1, 16>}, {pipeline_mode = #tpu.pipeline_mode<synchronous>, transform_indices = @transform_9, window_bounds = array<i64: 2, 16, 16>}, {pipeline_mode = #tpu.pipeline_mode<synchronous>, transform_indices = @transform_10, window_bounds = array<i64: 2, 1, 16>}, {pipeline_mode = #tpu.pipeline_mode<synchronous>, transform_indices = @transform_11, window_bounds = array<i64: 2, 16, 16>}, {pipeline_mode = #tpu.pipeline_mode<synchronous>, transform_indices = @transform_12, window_bounds = array<i64: 1, 16>}, {transform_indices = @transform_13, window_bounds = array<i64: 1, 32, 16>}]} {
    %c0 = arith.constant 0 : index
    %c0_0 = arith.constant 0 : index
    %c0_1 = arith.constant 0 : index
    %0 = vector.load %arg1[%c0, %c0_0, %c0_1] : memref<1x8x64xf32, #tpu.memory_space<vmem>>, vector<1x8x64xf32>
    %1 = vector.shape_cast %0 : vector<1x8x64xf32> to vector<8x64xf32>
    %cst = arith.constant dense<0.000000e+00> : vector<64xf32>
    %2 = vector.multi_reduction <add>, %1, %cst [0] : vector<8x64xf32> to vector<64xf32>
    %3 = vector.shape_cast %2 : vector<64xf32> to vector<1x64xf32>
    %cst_2 = arith.constant 8.000000e+00 : f32
    %4 = vector.broadcast %cst_2 : f32 to vector<1x64xf32>
    %5 = arith.divf %3, %4 : vector<1x64xf32>
    %6 = vector.broadcast %5 : vector<1x64xf32> to vector<8x64xf32>
    %7 = arith.subf %1, %6 : vector<8x64xf32>
    %8 = arith.mulf %7, %7 : vector<8x64xf32>
    %cst_3 = arith.constant dense<0.000000e+00> : vector<64xf32>
    %9 = vector.multi_reduction <add>, %8, %cst_3 [0] : vector<8x64xf32> to vector<64xf32>
    %10 = vector.shape_cast %9 : vector<64xf32> to vector<1x64xf32>
    %cst_4 = arith.constant 8.000000e+00 : f32
    %11 = vector.broadcast %cst_4 : f32 to vector<1x64xf32>
    %12 = arith.divf %10, %11 : vector<1x64xf32>
    %13 = vector.broadcast %5 : vector<1x64xf32> to vector<8x64xf32>
    %14 = arith.subf %1, %13 : vector<8x64xf32>
    %cst_5 = arith.constant 9.99999974E-6 : f32
    %15 = vector.broadcast %cst_5 : f32 to vector<1x64xf32>
    %16 = arith.addf %12, %15 : vector<1x64xf32>
    %17 = math.rsqrt %16 : vector<1x64xf32>
    %18 = vector.broadcast %17 : vector<1x64xf32> to vector<8x64xf32>
    %19 = arith.mulf %14, %18 : vector<8x64xf32>
    %c0_6 = arith.constant 0 : index
    %c0_7 = arith.constant 0 : index
    %20 = vector.load %arg2[%c0_6, %c0_7] : memref<8x1xf32, #tpu.memory_space<vmem>>, vector<8x1xf32>
    %21 = vector.broadcast %20 : vector<8x1xf32> to vector<8x64xf32>
    %22 = arith.mulf %19, %21 : vector<8x64xf32>
    %c0_8 = arith.constant 0 : index
    %c0_9 = arith.constant 0 : index
    %23 = vector.load %arg3[%c0_8, %c0_9] : memref<8x1xf32, #tpu.memory_space<vmem>>, vector<8x1xf32>
    %24 = vector.broadcast %23 : vector<8x1xf32> to vector<8x64xf32>
    %25 = arith.addf %22, %24 : vector<8x64xf32>
    %c0_10 = arith.constant 0 : index
    %c0_11 = arith.constant 0 : index
    %26 = vector.load %arg4[%c0_10, %c0_11] : memref<16x8xbf16, #tpu.memory_space<vmem>>, vector<16x8xbf16>
    %27 = arith.truncf %25 : vector<8x64xf32> to vector<8x64xbf16>
    %cst_12 = arith.constant dense<0.000000e+00> : vector<16x64xf32>
    %28 = tpu.matmul %26, %27, %cst_12 {dimension_numbers = #tpu.dot_dimension_numbers<[1], [0], [0], [1], [0, 0, 1, 1], [], []>} : vector<16x8xbf16>, vector<8x64xbf16>, vector<16x64xf32> -> vector<16x64xf32>
    %29 = arith.truncf %28 : vector<16x64xf32> to vector<16x64xbf16>
    %c0_13 = arith.constant 0 : index
    %c0_14 = arith.constant 0 : index
    %30 = vector.load %arg5[%c0_13, %c0_14] : memref<16x1xf32, #tpu.memory_space<vmem>>, vector<16x1xf32>
    %31 = arith.truncf %30 : vector<16x1xf32> to vector<16x1xbf16>
    %32 = vector.broadcast %31 : vector<16x1xbf16> to vector<16x64xbf16>
    %33 = arith.addf %29, %32 : vector<16x64xbf16>
    %34 = arith.extf %33 : vector<16x64xbf16> to vector<16x64xf32>
    %cst_15 = arith.constant 0.707106769 : f32
    %35 = vector.broadcast %cst_15 : f32 to vector<16x64xf32>
    %36 = arith.mulf %34, %35 : vector<16x64xf32>
    %37 = math.erf %36 : vector<16x64xf32>
    %38 = arith.truncf %37 : vector<16x64xf32> to vector<16x64xbf16>
    %cst_16 = arith.constant 5.000000e-01 : bf16
    %39 = vector.broadcast %cst_16 : bf16 to vector<16x64xbf16>
    %40 = arith.mulf %33, %39 : vector<16x64xbf16>
    %cst_17 = arith.constant 1.000000e+00 : bf16
    %41 = vector.broadcast %cst_17 : bf16 to vector<16x64xbf16>
    %42 = arith.addf %41, %38 : vector<16x64xbf16>
    %43 = arith.mulf %40, %42 : vector<16x64xbf16>
    %c0_18 = arith.constant 0 : index
    %c0_19 = arith.constant 0 : index
    %44 = vector.load %arg6[%c0_18, %c0_19] : memref<8x16xbf16, #tpu.memory_space<vmem>>, vector<8x16xbf16>
    %cst_20 = arith.constant dense<0.000000e+00> : vector<8x64xf32>
    %45 = tpu.matmul %44, %43, %cst_20 {dimension_numbers = #tpu.dot_dimension_numbers<[1], [0], [0], [1], [0, 0, 1, 1], [], []>} : vector<8x16xbf16>, vector<16x64xbf16>, vector<8x64xf32> -> vector<8x64xf32>
    %c0_21 = arith.constant 0 : index
    %c0_22 = arith.constant 0 : index
    %46 = vector.load %arg7[%c0_21, %c0_22] : memref<8x1xf32, #tpu.memory_space<vmem>>, vector<8x1xf32>
    %47 = vector.broadcast %46 : vector<8x1xf32> to vector<8x64xf32>
    %48 = arith.addf %45, %47 : vector<8x64xf32>
    %49 = arith.addf %1, %48 : vector<8x64xf32>
    %50 = vector.extract_strided_slice %49 {offsets = [0, 0], sizes = [8, 16], strides = [1, 1]} : vector<8x64xf32> to vector<8x16xf32>
    %c0_23 = arith.constant 0 : index
    %c0_24 = arith.constant 0 : index
    %c0_25 = arith.constant 0 : index
    %51 = vector.load %arg14[%c0_23, %c0_24, %c0_25] : memref<1x32x16xf32, #tpu.memory_space<vmem>>, vector<1x8x16xf32>
    %52 = vector.shape_cast %51 : vector<1x8x16xf32> to vector<8x16xf32>
    %53 = vector.shape_cast %50 : vector<8x16xf32> to vector<1x8x16xf32>
    tpu.vector_store %arg14[%c0_23, %c0_24, %c0_25], %53 {strides = array<i32>} : memref<1x32x16xf32, #tpu.memory_space<vmem>>, vector<1x8x16xf32>,
    %54 = vector.extract_strided_slice %49 {offsets = [0, 16], sizes = [8, 16], strides = [1, 1]} : vector<8x64xf32> to vector<8x16xf32>
    %c0_26 = arith.constant 0 : index
    %c8 = arith.constant 8 : index
    %c0_27 = arith.constant 0 : index
    %55 = vector.load %arg14[%c0_26, %c8, %c0_27] : memref<1x32x16xf32, #tpu.memory_space<vmem>>, vector<1x8x16xf32>
    %56 = vector.shape_cast %55 : vector<1x8x16xf32> to vector<8x16xf32>
    %57 = vector.shape_cast %54 : vector<8x16xf32> to vector<1x8x16xf32>
    tpu.vector_store %arg14[%c0_26, %c8, %c0_27], %57 {strides = array<i32>} : memref<1x32x16xf32, #tpu.memory_space<vmem>>, vector<1x8x16xf32>,
    %58 = vector.extract_strided_slice %49 {offsets = [0, 32], sizes = [8, 16], strides = [1, 1]} : vector<8x64xf32> to vector<8x16xf32>
    %c0_28 = arith.constant 0 : index
    %c16 = arith.constant 16 : index
    %c0_29 = arith.constant 0 : index
    %59 = vector.load %arg14[%c0_28, %c16, %c0_29] : memref<1x32x16xf32, #tpu.memory_space<vmem>>, vector<1x8x16xf32>
    %60 = vector.shape_cast %59 : vector<1x8x16xf32> to vector<8x16xf32>
    %61 = vector.shape_cast %58 : vector<8x16xf32> to vector<1x8x16xf32>
    tpu.vector_store %arg14[%c0_28, %c16, %c0_29], %61 {strides = array<i32>} : memref<1x32x16xf32, #tpu.memory_space<vmem>>, vector<1x8x16xf32>,
    %62 = vector.extract_strided_slice %49 {offsets = [0, 48], sizes = [8, 16], strides = [1, 1]} : vector<8x64xf32> to vector<8x16xf32>
    %c0_30 = arith.constant 0 : index
    %c24 = arith.constant 24 : index
    %c0_31 = arith.constant 0 : index
    %63 = vector.load %arg14[%c0_30, %c24, %c0_31] : memref<1x32x16xf32, #tpu.memory_space<vmem>>, vector<1x8x16xf32>
    %64 = vector.shape_cast %63 : vector<1x8x16xf32> to vector<8x16xf32>
    %65 = vector.shape_cast %62 : vector<8x16xf32> to vector<1x8x16xf32>
    tpu.vector_store %arg14[%c0_30, %c24, %c0_31], %65 {strides = array<i32>} : memref<1x32x16xf32, #tpu.memory_space<vmem>>, vector<1x8x16xf32>,
    %c0_32 = arith.constant 0 : index
    %c0_33 = arith.constant 0 : index
    %c0_34 = arith.constant 0 : index
    %66 = vector.load %arg14[%c0_32, %c0_33, %c0_34] : memref<1x32x16xf32, #tpu.memory_space<vmem>>, vector<1x32x16xf32>
    %67 = vector.shape_cast %66 : vector<1x32x16xf32> to vector<32x16xf32>
    %cst_35 = arith.constant dense<0.000000e+00> : vector<32xf32>
    %68 = vector.multi_reduction <add>, %67, %cst_35 [1] : vector<32x16xf32> to vector<32xf32>
    %69 = vector.shape_cast %68 : vector<32xf32> to vector<32x1xf32>
    %cst_36 = arith.constant 1.600000e+01 : f32
    %70 = vector.broadcast %cst_36 : f32 to vector<32x1xf32>
    %71 = arith.divf %69, %70 : vector<32x1xf32>
    %72 = vector.broadcast %71 : vector<32x1xf32> to vector<32x16xf32>
    %73 = arith.subf %67, %72 : vector<32x16xf32>
    %74 = arith.mulf %73, %73 : vector<32x16xf32>
    %cst_37 = arith.constant dense<0.000000e+00> : vector<32xf32>
    %75 = vector.multi_reduction <add>, %74, %cst_37 [1] : vector<32x16xf32> to vector<32xf32>
    %76 = vector.shape_cast %75 : vector<32xf32> to vector<32x1xf32>
    %cst_38 = arith.constant 1.600000e+01 : f32
    %77 = vector.broadcast %cst_38 : f32 to vector<32x1xf32>
    %78 = arith.divf %76, %77 : vector<32x1xf32>
    %79 = vector.broadcast %71 : vector<32x1xf32> to vector<32x16xf32>
    %80 = arith.subf %67, %79 : vector<32x16xf32>
    %cst_39 = arith.constant 9.99999974E-6 : f32
    %81 = vector.broadcast %cst_39 : f32 to vector<32x1xf32>
    %82 = arith.addf %78, %81 : vector<32x1xf32>
    %83 = math.rsqrt %82 : vector<32x1xf32>
    %84 = vector.broadcast %83 : vector<32x1xf32> to vector<32x16xf32>
    %85 = arith.mulf %80, %84 : vector<32x16xf32>
    %c0_40 = arith.constant 0 : index
    %c0_41 = arith.constant 0 : index
    %86 = vector.load %arg8[%c0_40, %c0_41] : memref<1x16xf32, #tpu.memory_space<vmem>>, vector<1x16xf32>
    %87 = vector.broadcast %86 : vector<1x16xf32> to vector<32x16xf32>
    %88 = arith.mulf %85, %87 : vector<32x16xf32>
    %c0_42 = arith.constant 0 : index
    %c0_43 = arith.constant 0 : index
    %89 = vector.load %arg9[%c0_42, %c0_43] : memref<1x16xf32, #tpu.memory_space<vmem>>, vector<1x16xf32>
    %90 = vector.broadcast %89 : vector<1x16xf32> to vector<32x16xf32>
    %91 = arith.addf %88, %90 : vector<32x16xf32>
    %92 = arith.truncf %91 : vector<32x16xf32> to vector<32x16xbf16>
    %c0_44 = arith.constant 0 : index
    %c0_45 = arith.constant 0 : index
    %c0_46 = arith.constant 0 : index
    %93 = vector.load %arg10[%c0_44, %c0_45, %c0_46] : memref<2x16x16xbf16, #tpu.memory_space<vmem>>, vector<1x16x16xbf16>
    %94 = vector.shape_cast %93 : vector<1x16x16xbf16> to vector<16x16xbf16>
    %cst_47 = arith.constant dense<0.000000e+00> : vector<32x16xf32>
    %95 = tpu.matmul %92, %94, %cst_47 {dimension_numbers = #tpu.dot_dimension_numbers<[1], [0], [0], [1], [0, 0, 1, 1], [], []>} : vector<32x16xbf16>, vector<16x16xbf16>, vector<32x16xf32> -> vector<32x16xf32>
    %96 = arith.truncf %95 : vector<32x16xf32> to vector<32x16xbf16>
    %c0_48 = arith.constant 0 : index
    %c0_49 = arith.constant 0 : index
    %c0_50 = arith.constant 0 : index
    %97 = vector.load %arg11[%c0_48, %c0_49, %c0_50] : memref<2x1x16xf32, #tpu.memory_space<vmem>>, vector<1x1x16xf32>
    %98 = vector.shape_cast %97 : vector<1x1x16xf32> to vector<1x16xf32>
    %99 = arith.truncf %98 : vector<1x16xf32> to vector<1x16xbf16>
    %100 = vector.broadcast %99 : vector<1x16xbf16> to vector<32x16xbf16>
    %101 = arith.addf %96, %100 : vector<32x16xbf16>
    %102 = arith.extf %101 : vector<32x16xbf16> to vector<32x16xf32>
    %cst_51 = arith.constant 0.707106769 : f32
    %103 = vector.broadcast %cst_51 : f32 to vector<32x16xf32>
    %104 = arith.mulf %102, %103 : vector<32x16xf32>
    %105 = math.erf %104 : vector<32x16xf32>
    %106 = arith.truncf %105 : vector<32x16xf32> to vector<32x16xbf16>
    %cst_52 = arith.constant 5.000000e-01 : bf16
    %107 = vector.broadcast %cst_52 : bf16 to vector<32x16xbf16>
    %108 = arith.mulf %101, %107 : vector<32x16xbf16>
    %cst_53 = arith.constant 1.000000e+00 : bf16
    %109 = vector.broadcast %cst_53 : bf16 to vector<32x16xbf16>
    %110 = arith.addf %109, %106 : vector<32x16xbf16>
    %111 = arith.mulf %108, %110 : vector<32x16xbf16>
    %c0_54 = arith.constant 0 : index
    %c0_55 = arith.constant 0 : index
    %c0_56 = arith.constant 0 : index
    %112 = vector.load %arg12[%c0_54, %c0_55, %c0_56] : memref<2x16x16xbf16, #tpu.memory_space<vmem>>, vector<1x16x16xbf16>
    %113 = vector.shape_cast %112 : vector<1x16x16xbf16> to vector<16x16xbf16>
    %cst_57 = arith.constant dense<0.000000e+00> : vector<32x16xf32>
    %114 = tpu.matmul %111, %113, %cst_57 {dimension_numbers = #tpu.dot_dimension_numbers<[1], [0], [0], [1], [0, 0, 1, 1], [], []>} : vector<32x16xbf16>, vector<16x16xbf16>, vector<32x16xf32> -> vector<32x16xf32>
    %c1 = arith.constant 1 : index
    %c0_58 = arith.constant 0 : index
    %c0_59 = arith.constant 0 : index
    %115 = vector.load %arg10[%c1, %c0_58, %c0_59] : memref<2x16x16xbf16, #tpu.memory_space<vmem>>, vector<1x16x16xbf16>
    %116 = vector.shape_cast %115 : vector<1x16x16xbf16> to vector<16x16xbf16>
    %cst_60 = arith.constant dense<0.000000e+00> : vector<32x16xf32>
    %117 = tpu.matmul %92, %116, %cst_60 {dimension_numbers = #tpu.dot_dimension_numbers<[1], [0], [0], [1], [0, 0, 1, 1], [], []>} : vector<32x16xbf16>, vector<16x16xbf16>, vector<32x16xf32> -> vector<32x16xf32>
    %118 = arith.truncf %117 : vector<32x16xf32> to vector<32x16xbf16>
    %c1_61 = arith.constant 1 : index
    %c0_62 = arith.constant 0 : index
    %c0_63 = arith.constant 0 : index
    %119 = vector.load %arg11[%c1_61, %c0_62, %c0_63] : memref<2x1x16xf32, #tpu.memory_space<vmem>>, vector<1x1x16xf32>
    %120 = vector.shape_cast %119 : vector<1x1x16xf32> to vector<1x16xf32>
    %121 = arith.truncf %120 : vector<1x16xf32> to vector<1x16xbf16>
    %122 = vector.broadcast %121 : vector<1x16xbf16> to vector<32x16xbf16>
    %123 = arith.addf %118, %122 : vector<32x16xbf16>
    %124 = arith.extf %123 : vector<32x16xbf16> to vector<32x16xf32>
    %cst_64 = arith.constant 0.707106769 : f32
    %125 = vector.broadcast %cst_64 : f32 to vector<32x16xf32>
    %126 = arith.mulf %124, %125 : vector<32x16xf32>
    %127 = math.erf %126 : vector<32x16xf32>
    %128 = arith.truncf %127 : vector<32x16xf32> to vector<32x16xbf16>
    %cst_65 = arith.constant 5.000000e-01 : bf16
    %129 = vector.broadcast %cst_65 : bf16 to vector<32x16xbf16>
    %130 = arith.mulf %123, %129 : vector<32x16xbf16>
    %cst_66 = arith.constant 1.000000e+00 : bf16
    %131 = vector.broadcast %cst_66 : bf16 to vector<32x16xbf16>
    %132 = arith.addf %131, %128 : vector<32x16xbf16>
    %133 = arith.mulf %130, %132 : vector<32x16xbf16>
    %c1_67 = arith.constant 1 : index
    %c0_68 = arith.constant 0 : index
    %c0_69 = arith.constant 0 : index
    %134 = vector.load %arg12[%c1_67, %c0_68, %c0_69] : memref<2x16x16xbf16, #tpu.memory_space<vmem>>, vector<1x16x16xbf16>
    %135 = vector.shape_cast %134 : vector<1x16x16xbf16> to vector<16x16xbf16>
    %cst_70 = arith.constant dense<0.000000e+00> : vector<32x16xf32>
    %136 = tpu.matmul %133, %135, %cst_70 {dimension_numbers = #tpu.dot_dimension_numbers<[1], [0], [0], [1], [0, 0, 1, 1], [], []>} : vector<32x16xbf16>, vector<16x16xbf16>, vector<32x16xf32> -> vector<32x16xf32>
    %137 = arith.addf %114, %136 : vector<32x16xf32>
    %138 = arith.addf %67, %137 : vector<32x16xf32>
    %c0_71 = arith.constant 0 : index
    %c0_72 = arith.constant 0 : index
    %139 = vector.load %arg13[%c0_71, %c0_72] : memref<1x16xf32, #tpu.memory_space<vmem>>, vector<1x16xf32>
    %140 = vector.broadcast %139 : vector<1x16xf32> to vector<32x16xf32>
    %141 = arith.addf %138, %140 : vector<32x16xf32>
    %c0_73 = arith.constant 0 : index
    %c0_74 = arith.constant 0 : index
    %c0_75 = arith.constant 0 : index
    %142 = vector.load %arg14[%c0_73, %c0_74, %c0_75] : memref<1x32x16xf32, #tpu.memory_space<vmem>>, vector<1x32x16xf32>
    %143 = vector.shape_cast %142 : vector<1x32x16xf32> to vector<32x16xf32>
    %144 = vector.shape_cast %141 : vector<32x16xf32> to vector<1x32x16xf32>
    tpu.vector_store %arg14[%c0_73, %c0_74, %c0_75], %144 {strides = array<i32>} : memref<1x32x16xf32, #tpu.memory_space<vmem>>, vector<1x32x16xf32>,
    return
  }
  func.func @transform_0(%arg0: i32) -> (i32, i32, i32) {
    %c0_i32 = arith.constant 0 : i32
    %c0_i32_0 = arith.constant 0 : i32
    %c0_i32_1 = arith.constant 0 : i32
    return %arg0, %c0_i32, %c0_i32_0 : i32, i32, i32
  }
  func.func @transform_1(%arg0: i32) -> (i32, i32) {
    %c0_i32 = arith.constant 0 : i32
    %c0_i32_0 = arith.constant 0 : i32
    %c0_i32_1 = arith.constant 0 : i32
    return %c0_i32, %c0_i32_0 : i32, i32
  }
  func.func @transform_2(%arg0: i32) -> (i32, i32) {
    %c0_i32 = arith.constant 0 : i32
    %c0_i32_0 = arith.constant 0 : i32
    %c0_i32_1 = arith.constant 0 : i32
    return %c0_i32, %c0_i32_0 : i32, i32
  }
  func.func @transform_3(%arg0: i32) -> (i32, i32) {
    %c0_i32 = arith.constant 0 : i32
    %c0_i32_0 = arith.constant 0 : i32
    %c0_i32_1 = arith.constant 0 : i32
    return %c0_i32, %c0_i32_0 : i32, i32
  }
  func.func @transform_4(%arg0: i32) -> (i32, i32) {
    %c0_i32 = arith.constant 0 : i32
    %c0_i32_0 = arith.constant 0 : i32
    %c0_i32_1 = arith.constant 0 : i32
    return %c0_i32, %c0_i32_0 : i32, i32
  }
  func.func @transform_5(%arg0: i32) -> (i32, i32) {
    %c0_i32 = arith.constant 0 : i32
    %c0_i32_0 = arith.constant 0 : i32
    %c0_i32_1 = arith.constant 0 : i32
    return %c0_i32, %c0_i32_0 : i32, i32
  }
  func.func @transform_6(%arg0: i32) -> (i32, i32) {
    %c0_i32 = arith.constant 0 : i32
    %c0_i32_0 = arith.constant 0 : i32
    %c0_i32_1 = arith.constant 0 : i32
    return %c0_i32, %c0_i32_0 : i32, i32
  }
  func.func @transform_7(%arg0: i32) -> (i32, i32) {
    %c0_i32 = arith.constant 0 : i32
    %c0_i32_0 = arith.constant 0 : i32
    %c0_i32_1 = arith.constant 0 : i32
    return %c0_i32, %c0_i32_0 : i32, i32
  }
  func.func @transform_8(%arg0: i32) -> (i32, i32) {
    %c0_i32 = arith.constant 0 : i32
    %c0_i32_0 = arith.constant 0 : i32
    %c0_i32_1 = arith.constant 0 : i32
    return %c0_i32, %c0_i32_0 : i32, i32
  }
  func.func @transform_9(%arg0: i32) -> (i32, i32, i32) {
    %c0_i32 = arith.constant 0 : i32
    %c0_i32_0 = arith.constant 0 : i32
    %c0_i32_1 = arith.constant 0 : i32
    %c0_i32_2 = arith.constant 0 : i32
    return %c0_i32, %c0_i32_0, %c0_i32_1 : i32, i32, i32
  }
  func.func @transform_10(%arg0: i32) -> (i32, i32, i32) {
    %c0_i32 = arith.constant 0 : i32
    %c0_i32_0 = arith.constant 0 : i32
    %c0_i32_1 = arith.constant 0 : i32
    %c0_i32_2 = arith.constant 0 : i32
    return %c0_i32, %c0_i32_0, %c0_i32_1 : i32, i32, i32
  }
  func.func @transform_11(%arg0: i32) -> (i32, i32, i32) {
    %c0_i32 = arith.constant 0 : i32
    %c0_i32_0 = arith.constant 0 : i32
    %c0_i32_1 = arith.constant 0 : i32
    %c0_i32_2 = arith.constant 0 : i32
    return %c0_i32, %c0_i32_0, %c0_i32_1 : i32, i32, i32
  }
  func.func @transform_12(%arg0: i32) -> (i32, i32) {
    %c0_i32 = arith.constant 0 : i32
    %c0_i32_0 = arith.constant 0 : i32
    %c0_i32_1 = arith.constant 0 : i32
    return %c0_i32, %c0_i32_0 : i32, i32
  }
  func.func @transform_13(%arg0: i32) -> (i32, i32, i32) {
    %c0_i32 = arith.constant 0 : i32
    %c0_i32_0 = arith.constant 0 : i32
    %c0_i32_1 = arith.constant 0 : i32
    return %arg0, %c0_i32, %c0_i32_0 : i32, i32, i32
  }
}

module attributes {stable_mosaic.version = 11 : i64} {
  func.func @mixer_block_kernel(%arg0: i32, %arg1: memref<1x8x64xf32, #tpu.memory_space<vmem>>, %arg2: memref<8x1xf32, #tpu.memory_space<vmem>>, %arg3: memref<8x1xf32, #tpu.memory_space<vmem>>, %arg4: memref<16x8xbf16, #tpu.memory_space<vmem>>, %arg5: memref<16x1xf32, #tpu.memory_space<vmem>>, %arg6: memref<8x16xbf16, #tpu.memory_space<vmem>>, %arg7: memref<8x1xf32, #tpu.memory_space<vmem>>, %arg8: memref<1x16xf32, #tpu.memory_space<vmem>>, %arg9: memref<1x16xf32, #tpu.memory_space<vmem>>, %arg10: memref<2x16x16xbf16, #tpu.memory_space<vmem>>, %arg11: memref<2x1x16xf32, #tpu.memory_space<vmem>>, %arg12: memref<2x16x16xbf16, #tpu.memory_space<vmem>>, %arg13: memref<1x16xf32, #tpu.memory_space<vmem>>, %arg14: memref<1x32x16xf32, #tpu.memory_space<vmem>>) attributes {dimension_semantics = [#tpu.dimension_semantics<parallel>], iteration_bounds = array<i64: 2>, scalar_prefetch = 0 : i64, scratch_operands = 0 : i64, tpu.core_type = #tpu.core_type<tc>, window_params = [{transform_indices = @transform_0, window_bounds = array<i64: 1, 8, 64>}, {pipeline_mode = #tpu.pipeline_mode<synchronous>, transform_indices = @transform_1, window_bounds = array<i64: 8, 1>}, {pipeline_mode = #tpu.pipeline_mode<synchronous>, transform_indices = @transform_2, window_bounds = array<i64: 8, 1>}, {pipeline_mode = #tpu.pipeline_mode<synchronous>, transform_indices = @transform_3, window_bounds = array<i64: 16, 8>}, {pipeline_mode = #tpu.pipeline_mode<synchronous>, transform_indices = @transform_4, window_bounds = array<i64: 16, 1>}, {pipeline_mode = #tpu.pipeline_mode<synchronous>, transform_indices = @transform_5, window_bounds = array<i64: 8, 16>}, {pipeline_mode = #tpu.pipeline_mode<synchronous>, transform_indices = @transform_6, window_bounds = array<i64: 8, 1>}, {pipeline_mode = #tpu.pipeline_mode<synchronous>, transform_indices = @transform_7, window_bounds = array<i64: 1, 16>}, {pipeline_mode = #tpu.pipeline_mode<synchronous>, transform_indices = @transform_8, window_bounds = array<i64: 1, 16>}, {pipeline_mode = #tpu.pipeline_mode<synchronous>, transform_indices = @transform_9, window_bounds = array<i64: 2, 16, 16>}, {pipeline_mode = #tpu.pipeline_mode<synchronous>, transform_indices = @transform_10, window_bounds = array<i64: 2, 1, 16>}, {pipeline_mode = #tpu.pipeline_mode<synchronous>, transform_indices = @transform_11, window_bounds = array<i64: 2, 16, 16>}, {pipeline_mode = #tpu.pipeline_mode<synchronous>, transform_indices = @transform_12, window_bounds = array<i64: 1, 16>}, {transform_indices = @transform_13, window_bounds = array<i64: 1, 32, 16>}]} {
    %c0 = arith.constant 0 : index
    %c0_0 = arith.constant 0 : index
    %c0_1 = arith.constant 0 : index
    %0 = vector.load %arg1[%c0, %c0_0, %c0_1] : memref<1x8x64xf32, #tpu.memory_space<vmem>>, vector<1x8x64xf32>
    %1 = vector.shape_cast %0 : vector<1x8x64xf32> to vector<8x64xf32>
    %cst = arith.constant dense<0.000000e+00> : vector<64xf32>
    %2 = vector.multi_reduction <add>, %1, %cst [0] : vector<8x64xf32> to vector<64xf32>
    %3 = vector.shape_cast %2 : vector<64xf32> to vector<1x64xf32>
    %cst_2 = arith.constant 8.000000e+00 : f32
    %4 = vector.broadcast %cst_2 : f32 to vector<1x64xf32>
    %5 = arith.divf %3, %4 : vector<1x64xf32>
    %6 = vector.broadcast %5 : vector<1x64xf32> to vector<8x64xf32>
    %7 = arith.subf %1, %6 : vector<8x64xf32>
    %8 = arith.mulf %7, %7 : vector<8x64xf32>
    %cst_3 = arith.constant dense<0.000000e+00> : vector<64xf32>
    %9 = vector.multi_reduction <add>, %8, %cst_3 [0] : vector<8x64xf32> to vector<64xf32>
    %10 = vector.shape_cast %9 : vector<64xf32> to vector<1x64xf32>
    %cst_4 = arith.constant 8.000000e+00 : f32
    %11 = vector.broadcast %cst_4 : f32 to vector<1x64xf32>
    %12 = arith.divf %10, %11 : vector<1x64xf32>
    %13 = vector.broadcast %5 : vector<1x64xf32> to vector<8x64xf32>
    %14 = arith.subf %1, %13 : vector<8x64xf32>
    %cst_5 = arith.constant 9.99999974E-6 : f32
    %15 = vector.broadcast %cst_5 : f32 to vector<1x64xf32>
    %16 = arith.addf %12, %15 : vector<1x64xf32>
    %17 = math.rsqrt %16 : vector<1x64xf32>
    %18 = vector.broadcast %17 : vector<1x64xf32> to vector<8x64xf32>
    %19 = arith.mulf %14, %18 : vector<8x64xf32>
    %c0_6 = arith.constant 0 : index
    %c0_7 = arith.constant 0 : index
    %20 = vector.load %arg2[%c0_6, %c0_7] : memref<8x1xf32, #tpu.memory_space<vmem>>, vector<8x1xf32>
    %21 = vector.broadcast %20 : vector<8x1xf32> to vector<8x64xf32>
    %22 = arith.mulf %19, %21 : vector<8x64xf32>
    %c0_8 = arith.constant 0 : index
    %c0_9 = arith.constant 0 : index
    %23 = vector.load %arg3[%c0_8, %c0_9] : memref<8x1xf32, #tpu.memory_space<vmem>>, vector<8x1xf32>
    %24 = vector.broadcast %23 : vector<8x1xf32> to vector<8x64xf32>
    %25 = arith.addf %22, %24 : vector<8x64xf32>
    %c0_10 = arith.constant 0 : index
    %c0_11 = arith.constant 0 : index
    %26 = vector.load %arg4[%c0_10, %c0_11] : memref<16x8xbf16, #tpu.memory_space<vmem>>, vector<16x8xbf16>
    %27 = arith.truncf %25 : vector<8x64xf32> to vector<8x64xbf16>
    %cst_12 = arith.constant dense<0.000000e+00> : vector<16x64xf32>
    %28 = tpu.matmul %26, %27, %cst_12 {dimension_numbers = #tpu.dot_dimension_numbers<[1], [0], [0], [1], [0, 0, 1, 1], [], []>} : vector<16x8xbf16>, vector<8x64xbf16>, vector<16x64xf32> -> vector<16x64xf32>
    %29 = arith.truncf %28 : vector<16x64xf32> to vector<16x64xbf16>
    %c0_13 = arith.constant 0 : index
    %c0_14 = arith.constant 0 : index
    %30 = vector.load %arg5[%c0_13, %c0_14] : memref<16x1xf32, #tpu.memory_space<vmem>>, vector<16x1xf32>
    %31 = arith.truncf %30 : vector<16x1xf32> to vector<16x1xbf16>
    %32 = vector.broadcast %31 : vector<16x1xbf16> to vector<16x64xbf16>
    %33 = arith.addf %29, %32 : vector<16x64xbf16>
    %34 = arith.extf %33 : vector<16x64xbf16> to vector<16x64xf32>
    %cst_15 = arith.constant 0.707106769 : f32
    %35 = vector.broadcast %cst_15 : f32 to vector<16x64xf32>
    %36 = arith.mulf %34, %35 : vector<16x64xf32>
    %37 = math.erf %36 : vector<16x64xf32>
    %38 = arith.truncf %37 : vector<16x64xf32> to vector<16x64xbf16>
    %cst_16 = arith.constant 5.000000e-01 : bf16
    %39 = vector.broadcast %cst_16 : bf16 to vector<16x64xbf16>
    %40 = arith.mulf %33, %39 : vector<16x64xbf16>
    %cst_17 = arith.constant 1.000000e+00 : bf16
    %41 = vector.broadcast %cst_17 : bf16 to vector<16x64xbf16>
    %42 = arith.addf %41, %38 : vector<16x64xbf16>
    %43 = arith.mulf %40, %42 : vector<16x64xbf16>
    %c0_18 = arith.constant 0 : index
    %c0_19 = arith.constant 0 : index
    %44 = vector.load %arg6[%c0_18, %c0_19] : memref<8x16xbf16, #tpu.memory_space<vmem>>, vector<8x16xbf16>
    %cst_20 = arith.constant dense<0.000000e+00> : vector<8x64xf32>
    %45 = tpu.matmul %44, %43, %cst_20 {dimension_numbers = #tpu.dot_dimension_numbers<[1], [0], [0], [1], [0, 0, 1, 1], [], []>} : vector<8x16xbf16>, vector<16x64xbf16>, vector<8x64xf32> -> vector<8x64xf32>
    %c0_21 = arith.constant 0 : index
    %c0_22 = arith.constant 0 : index
    %46 = vector.load %arg7[%c0_21, %c0_22] : memref<8x1xf32, #tpu.memory_space<vmem>>, vector<8x1xf32>
    %47 = vector.broadcast %46 : vector<8x1xf32> to vector<8x64xf32>
    %48 = arith.addf %45, %47 : vector<8x64xf32>
    %49 = arith.addf %1, %48 : vector<8x64xf32>
    %50 = vector.extract_strided_slice %49 {offsets = [0, 0], sizes = [8, 16], strides = [1, 1]} : vector<8x64xf32> to vector<8x16xf32>
    %c0_23 = arith.constant 0 : index
    %c0_24 = arith.constant 0 : index
    %c0_25 = arith.constant 0 : index
    %51 = vector.load %arg14[%c0_23, %c0_24, %c0_25] : memref<1x32x16xf32, #tpu.memory_space<vmem>>, vector<1x8x16xf32>
    %52 = vector.shape_cast %51 : vector<1x8x16xf32> to vector<8x16xf32>
    %53 = vector.shape_cast %50 : vector<8x16xf32> to vector<1x8x16xf32>
    tpu.vector_store %arg14[%c0_23, %c0_24, %c0_25], %53 {strides = array<i32>} : memref<1x32x16xf32, #tpu.memory_space<vmem>>, vector<1x8x16xf32>,
    %54 = vector.extract_strided_slice %49 {offsets = [0, 16], sizes = [8, 16], strides = [1, 1]} : vector<8x64xf32> to vector<8x16xf32>
    %c0_26 = arith.constant 0 : index
    %c8 = arith.constant 8 : index
    %c0_27 = arith.constant 0 : index
    %55 = vector.load %arg14[%c0_26, %c8, %c0_27] : memref<1x32x16xf32, #tpu.memory_space<vmem>>, vector<1x8x16xf32>
    %56 = vector.shape_cast %55 : vector<1x8x16xf32> to vector<8x16xf32>
    %57 = vector.shape_cast %54 : vector<8x16xf32> to vector<1x8x16xf32>
    tpu.vector_store %arg14[%c0_26, %c8, %c0_27], %57 {strides = array<i32>} : memref<1x32x16xf32, #tpu.memory_space<vmem>>, vector<1x8x16xf32>,
    %58 = vector.extract_strided_slice %49 {offsets = [0, 32], sizes = [8, 16], strides = [1, 1]} : vector<8x64xf32> to vector<8x16xf32>
    %c0_28 = arith.constant 0 : index
    %c16 = arith.constant 16 : index
    %c0_29 = arith.constant 0 : index
    %59 = vector.load %arg14[%c0_28, %c16, %c0_29] : memref<1x32x16xf32, #tpu.memory_space<vmem>>, vector<1x8x16xf32>
    %60 = vector.shape_cast %59 : vector<1x8x16xf32> to vector<8x16xf32>
    %61 = vector.shape_cast %58 : vector<8x16xf32> to vector<1x8x16xf32>
    tpu.vector_store %arg14[%c0_28, %c16, %c0_29], %61 {strides = array<i32>} : memref<1x32x16xf32, #tpu.memory_space<vmem>>, vector<1x8x16xf32>,
    %62 = vector.extract_strided_slice %49 {offsets = [0, 48], sizes = [8, 16], strides = [1, 1]} : vector<8x64xf32> to vector<8x16xf32>
    %c0_30 = arith.constant 0 : index
    %c24 = arith.constant 24 : index
    %c0_31 = arith.constant 0 : index
    %63 = vector.load %arg14[%c0_30, %c24, %c0_31] : memref<1x32x16xf32, #tpu.memory_space<vmem>>, vector<1x8x16xf32>
    %64 = vector.shape_cast %63 : vector<1x8x16xf32> to vector<8x16xf32>
    %65 = vector.shape_cast %62 : vector<8x16xf32> to vector<1x8x16xf32>
    tpu.vector_store %arg14[%c0_30, %c24, %c0_31], %65 {strides = array<i32>} : memref<1x32x16xf32, #tpu.memory_space<vmem>>, vector<1x8x16xf32>,
    %c0_32 = arith.constant 0 : index
    %c0_33 = arith.constant 0 : index
    %c0_34 = arith.constant 0 : index
    %66 = vector.load %arg14[%c0_32, %c0_33, %c0_34] : memref<1x32x16xf32, #tpu.memory_space<vmem>>, vector<1x32x16xf32>
    %67 = vector.shape_cast %66 : vector<1x32x16xf32> to vector<32x16xf32>
    %cst_35 = arith.constant dense<0.000000e+00> : vector<32xf32>
    %68 = vector.multi_reduction <add>, %67, %cst_35 [1] : vector<32x16xf32> to vector<32xf32>
    %69 = vector.shape_cast %68 : vector<32xf32> to vector<32x1xf32>
    %cst_36 = arith.constant 1.600000e+01 : f32
    %70 = vector.broadcast %cst_36 : f32 to vector<32x1xf32>
    %71 = arith.divf %69, %70 : vector<32x1xf32>
    %72 = vector.broadcast %71 : vector<32x1xf32> to vector<32x16xf32>
    %73 = arith.subf %67, %72 : vector<32x16xf32>
    %74 = arith.mulf %73, %73 : vector<32x16xf32>
    %cst_37 = arith.constant dense<0.000000e+00> : vector<32xf32>
    %75 = vector.multi_reduction <add>, %74, %cst_37 [1] : vector<32x16xf32> to vector<32xf32>
    %76 = vector.shape_cast %75 : vector<32xf32> to vector<32x1xf32>
    %cst_38 = arith.constant 1.600000e+01 : f32
    %77 = vector.broadcast %cst_38 : f32 to vector<32x1xf32>
    %78 = arith.divf %76, %77 : vector<32x1xf32>
    %79 = vector.broadcast %71 : vector<32x1xf32> to vector<32x16xf32>
    %80 = arith.subf %67, %79 : vector<32x16xf32>
    %cst_39 = arith.constant 9.99999974E-6 : f32
    %81 = vector.broadcast %cst_39 : f32 to vector<32x1xf32>
    %82 = arith.addf %78, %81 : vector<32x1xf32>
    %83 = math.rsqrt %82 : vector<32x1xf32>
    %84 = vector.broadcast %83 : vector<32x1xf32> to vector<32x16xf32>
    %85 = arith.mulf %80, %84 : vector<32x16xf32>
    %c0_40 = arith.constant 0 : index
    %c0_41 = arith.constant 0 : index
    %86 = vector.load %arg8[%c0_40, %c0_41] : memref<1x16xf32, #tpu.memory_space<vmem>>, vector<1x16xf32>
    %87 = vector.broadcast %86 : vector<1x16xf32> to vector<32x16xf32>
    %88 = arith.mulf %85, %87 : vector<32x16xf32>
    %c0_42 = arith.constant 0 : index
    %c0_43 = arith.constant 0 : index
    %89 = vector.load %arg9[%c0_42, %c0_43] : memref<1x16xf32, #tpu.memory_space<vmem>>, vector<1x16xf32>
    %90 = vector.broadcast %89 : vector<1x16xf32> to vector<32x16xf32>
    %91 = arith.addf %88, %90 : vector<32x16xf32>
    %92 = arith.truncf %91 : vector<32x16xf32> to vector<32x16xbf16>
    %c0_44 = arith.constant 0 : index
    %c0_45 = arith.constant 0 : index
    %c0_46 = arith.constant 0 : index
    %93 = vector.load %arg10[%c0_44, %c0_45, %c0_46] : memref<2x16x16xbf16, #tpu.memory_space<vmem>>, vector<1x16x16xbf16>
    %94 = vector.shape_cast %93 : vector<1x16x16xbf16> to vector<16x16xbf16>
    %cst_47 = arith.constant dense<0.000000e+00> : vector<32x16xf32>
    %95 = tpu.matmul %92, %94, %cst_47 {dimension_numbers = #tpu.dot_dimension_numbers<[1], [0], [0], [1], [0, 0, 1, 1], [], []>} : vector<32x16xbf16>, vector<16x16xbf16>, vector<32x16xf32> -> vector<32x16xf32>
    %96 = arith.truncf %95 : vector<32x16xf32> to vector<32x16xbf16>
    %c0_48 = arith.constant 0 : index
    %c0_49 = arith.constant 0 : index
    %c0_50 = arith.constant 0 : index
    %97 = vector.load %arg11[%c0_48, %c0_49, %c0_50] : memref<2x1x16xf32, #tpu.memory_space<vmem>>, vector<1x1x16xf32>
    %98 = vector.shape_cast %97 : vector<1x1x16xf32> to vector<1x16xf32>
    %99 = arith.truncf %98 : vector<1x16xf32> to vector<1x16xbf16>
    %100 = vector.broadcast %99 : vector<1x16xbf16> to vector<32x16xbf16>
    %101 = arith.addf %96, %100 : vector<32x16xbf16>
    %102 = arith.extf %101 : vector<32x16xbf16> to vector<32x16xf32>
    %cst_51 = arith.constant 0.707106769 : f32
    %103 = vector.broadcast %cst_51 : f32 to vector<32x16xf32>
    %104 = arith.mulf %102, %103 : vector<32x16xf32>
    %105 = math.erf %104 : vector<32x16xf32>
    %106 = arith.truncf %105 : vector<32x16xf32> to vector<32x16xbf16>
    %cst_52 = arith.constant 5.000000e-01 : bf16
    %107 = vector.broadcast %cst_52 : bf16 to vector<32x16xbf16>
    %108 = arith.mulf %101, %107 : vector<32x16xbf16>
    %cst_53 = arith.constant 1.000000e+00 : bf16
    %109 = vector.broadcast %cst_53 : bf16 to vector<32x16xbf16>
    %110 = arith.addf %109, %106 : vector<32x16xbf16>
    %111 = arith.mulf %108, %110 : vector<32x16xbf16>
    %c0_54 = arith.constant 0 : index
    %c0_55 = arith.constant 0 : index
    %c0_56 = arith.constant 0 : index
    %112 = vector.load %arg12[%c0_54, %c0_55, %c0_56] : memref<2x16x16xbf16, #tpu.memory_space<vmem>>, vector<1x16x16xbf16>
    %113 = vector.shape_cast %112 : vector<1x16x16xbf16> to vector<16x16xbf16>
    %cst_57 = arith.constant dense<0.000000e+00> : vector<32x16xf32>
    %114 = tpu.matmul %111, %113, %cst_57 {dimension_numbers = #tpu.dot_dimension_numbers<[1], [0], [0], [1], [0, 0, 1, 1], [], []>} : vector<32x16xbf16>, vector<16x16xbf16>, vector<32x16xf32> -> vector<32x16xf32>
    %c1 = arith.constant 1 : index
    %c0_58 = arith.constant 0 : index
    %c0_59 = arith.constant 0 : index
    %115 = vector.load %arg10[%c1, %c0_58, %c0_59] : memref<2x16x16xbf16, #tpu.memory_space<vmem>>, vector<1x16x16xbf16>
    %116 = vector.shape_cast %115 : vector<1x16x16xbf16> to vector<16x16xbf16>
    %cst_60 = arith.constant dense<0.000000e+00> : vector<32x16xf32>
    %117 = tpu.matmul %92, %116, %cst_60 {dimension_numbers = #tpu.dot_dimension_numbers<[1], [0], [0], [1], [0, 0, 1, 1], [], []>} : vector<32x16xbf16>, vector<16x16xbf16>, vector<32x16xf32> -> vector<32x16xf32>
    %118 = arith.truncf %117 : vector<32x16xf32> to vector<32x16xbf16>
    %c1_61 = arith.constant 1 : index
    %c0_62 = arith.constant 0 : index
    %c0_63 = arith.constant 0 : index
    %119 = vector.load %arg11[%c1_61, %c0_62, %c0_63] : memref<2x1x16xf32, #tpu.memory_space<vmem>>, vector<1x1x16xf32>
    %120 = vector.shape_cast %119 : vector<1x1x16xf32> to vector<1x16xf32>
    %121 = arith.truncf %120 : vector<1x16xf32> to vector<1x16xbf16>
    %122 = vector.broadcast %121 : vector<1x16xbf16> to vector<32x16xbf16>
    %123 = arith.addf %118, %122 : vector<32x16xbf16>
    %124 = arith.extf %123 : vector<32x16xbf16> to vector<32x16xf32>
    %cst_64 = arith.constant 0.707106769 : f32
    %125 = vector.broadcast %cst_64 : f32 to vector<32x16xf32>
    %126 = arith.mulf %124, %125 : vector<32x16xf32>
    %127 = math.erf %126 : vector<32x16xf32>
    %128 = arith.truncf %127 : vector<32x16xf32> to vector<32x16xbf16>
    %cst_65 = arith.constant 5.000000e-01 : bf16
    %129 = vector.broadcast %cst_65 : bf16 to vector<32x16xbf16>
    %130 = arith.mulf %123, %129 : vector<32x16xbf16>
    %cst_66 = arith.constant 1.000000e+00 : bf16
    %131 = vector.broadcast %cst_66 : bf16 to vector<32x16xbf16>
    %132 = arith.addf %131, %128 : vector<32x16xbf16>
    %133 = arith.mulf %130, %132 : vector<32x16xbf16>
    %c1_67 = arith.constant 1 : index
    %c0_68 = arith.constant 0 : index
    %c0_69 = arith.constant 0 : index
    %134 = vector.load %arg12[%c1_67, %c0_68, %c0_69] : memref<2x16x16xbf16, #tpu.memory_space<vmem>>, vector<1x16x16xbf16>
    %135 = vector.shape_cast %134 : vector<1x16x16xbf16> to vector<16x16xbf16>
    %cst_70 = arith.constant dense<0.000000e+00> : vector<32x16xf32>
    %136 = tpu.matmul %133, %135, %cst_70 {dimension_numbers = #tpu.dot_dimension_numbers<[1], [0], [0], [1], [0, 0, 1, 1], [], []>} : vector<32x16xbf16>, vector<16x16xbf16>, vector<32x16xf32> -> vector<32x16xf32>
    %137 = arith.addf %114, %136 : vector<32x16xf32>
    %138 = arith.addf %67, %137 : vector<32x16xf32>
    %c0_71 = arith.constant 0 : index
    %c0_72 = arith.constant 0 : index
    %139 = vector.load %arg13[%c0_71, %c0_72] : memref<1x16xf32, #tpu.memory_space<vmem>>, vector<1x16xf32>
    %140 = vector.broadcast %139 : vector<1x16xf32> to vector<32x16xf32>
    %141 = arith.addf %138, %140 : vector<32x16xf32>
    %c0_73 = arith.constant 0 : index
    %c0_74 = arith.constant 0 : index
    %c0_75 = arith.constant 0 : index
    %142 = vector.load %arg14[%c0_73, %c0_74, %c0_75] : memref<1x32x16xf32, #tpu.memory_space<vmem>>, vector<1x32x16xf32>
    %143 = vector.shape_cast %142 : vector<1x32x16xf32> to vector<32x16xf32>
    %144 = vector.shape_cast %141 : vector<32x16xf32> to vector<1x32x16xf32>
    tpu.vector_store %arg14[%c0_73, %c0_74, %c0_75], %144 {strides = array<i32>} : memref<1x32x16xf32, #tpu.memory_space<vmem>>, vector<1x32x16xf32>,
    return
  }
  func.func @transform_0(%arg0: i32) -> (i32, i32, i32) {
    %c0_i32 = arith.constant 0 : i32
    %c0_i32_0 = arith.constant 0 : i32
    %c0_i32_1 = arith.constant 0 : i32
    return %arg0, %c0_i32, %c0_i32_0 : i32, i32, i32
  }
  func.func @transform_1(%arg0: i32) -> (i32, i32) {
    %c0_i32 = arith.constant 0 : i32
    %c0_i32_0 = arith.constant 0 : i32
    %c0_i32_1 = arith.constant 0 : i32
    return %c0_i32, %c0_i32_0 : i32, i32
  }
  func.func @transform_2(%arg0: i32) -> (i32, i32) {
    %c0_i32 = arith.constant 0 : i32
    %c0_i32_0 = arith.constant 0 : i32
    %c0_i32_1 = arith.constant 0 : i32
    return %c0_i32, %c0_i32_0 : i32, i32
  }
  func.func @transform_3(%arg0: i32) -> (i32, i32) {
    %c0_i32 = arith.constant 0 : i32
    %c0_i32_0 = arith.constant 0 : i32
    %c0_i32_1 = arith.constant 0 : i32
    return %c0_i32, %c0_i32_0 : i32, i32
  }
  func.func @transform_4(%arg0: i32) -> (i32, i32) {
    %c0_i32 = arith.constant 0 : i32
    %c0_i32_0 = arith.constant 0 : i32
    %c0_i32_1 = arith.constant 0 : i32
    return %c0_i32, %c0_i32_0 : i32, i32
  }
  func.func @transform_5(%arg0: i32) -> (i32, i32) {
    %c0_i32 = arith.constant 0 : i32
    %c0_i32_0 = arith.constant 0 : i32
    %c0_i32_1 = arith.constant 0 : i32
    return %c0_i32, %c0_i32_0 : i32, i32
  }
  func.func @transform_6(%arg0: i32) -> (i32, i32) {
    %c0_i32 = arith.constant 0 : i32
    %c0_i32_0 = arith.constant 0 : i32
    %c0_i32_1 = arith.constant 0 : i32
    return %c0_i32, %c0_i32_0 : i32, i32
  }
  func.func @transform_7(%arg0: i32) -> (i32, i32) {
    %c0_i32 = arith.constant 0 : i32
    %c0_i32_0 = arith.constant 0 : i32
    %c0_i32_1 = arith.constant 0 : i32
    return %c0_i32, %c0_i32_0 : i32, i32
  }
  func.func @transform_8(%arg0: i32) -> (i32, i32) {
    %c0_i32 = arith.constant 0 : i32
    %c0_i32_0 = arith.constant 0 : i32
    %c0_i32_1 = arith.constant 0 : i32
    return %c0_i32, %c0_i32_0 : i32, i32
  }
  func.func @transform_9(%arg0: i32) -> (i32, i32, i32) {
    %c0_i32 = arith.constant 0 : i32
    %c0_i32_0 = arith.constant 0 : i32
    %c0_i32_1 = arith.constant 0 : i32
    %c0_i32_2 = arith.constant 0 : i32
    return %c0_i32, %c0_i32_0, %c0_i32_1 : i32, i32, i32
  }
  func.func @transform_10(%arg0: i32) -> (i32, i32, i32) {
    %c0_i32 = arith.constant 0 : i32
    %c0_i32_0 = arith.constant 0 : i32
    %c0_i32_1 = arith.constant 0 : i32
    %c0_i32_2 = arith.constant 0 : i32
    return %c0_i32, %c0_i32_0, %c0_i32_1 : i32, i32, i32
  }
  func.func @transform_11(%arg0: i32) -> (i32, i32, i32) {
    %c0_i32 = arith.constant 0 : i32
    %c0_i32_0 = arith.constant 0 : i32
    %c0_i32_1 = arith.constant 0 : i32
    %c0_i32_2 = arith.constant 0 : i32
    return %c0_i32, %c0_i32_0, %c0_i32_1 : i32, i32, i32
  }
  func.func @transform_12(%arg0: i32) -> (i32, i32) {
    %c0_i32 = arith.constant 0 : i32
    %c0_i32_0 = arith.constant 0 : i32
    %c0_i32_1 = arith.constant 0 : i32
    return %c0_i32, %c0_i32_0 : i32, i32
  }
  func.func @transform_13(%arg0: i32) -> (i32, i32, i32) {
    %c0_i32 = arith.constant 0 : i32
    %c0_i32_0 = arith.constant 0 : i32
    %c0_i32_1 = arith.constant 0 : i32
    return %arg0, %c0_i32, %c0_i32_0 : i32, i32, i32
  }
}

</mosaic_0001>

<bundles_post_ra>
// kernel: tpu_custom_call.1
= control target key start
LH: loop header
LB: loop body
LE: loop exit
PB: predicated region body
PF: predicated region fallthrough
CT: control target
= control target key end

     0   :  { %s1317_s25 = smov 0   ;;  %s1456_s0 = inlined_call_operand.vmem [shape: f32[2,8,64], index: 0, kind: input, shape index: {}]   ;;  %s1457_s1 = inlined_call_operand.vmem [shape: f32[8,1], index: 1, kind: input, shape index: {}]   ;;  %s1458_s2 = inlined_call_operand.vmem [shape: f32[8,1], index: 2, kind: input, shape index: {}]   ;;  %s1459_s3 = inlined_call_operand.vmem [shape: bf16[16,8], index: 3, kind: input, shape index: {}]   ;;  %s1460_s4 = inlined_call_operand.vmem [shape: f32[16,1], index: 4, kind: input, shape index: {}]   ;;  %s1461_s5 = inlined_call_operand.vmem [shape: bf16[8,16], index: 5, kind: input, shape index: {}]   ;;  %s1462_s6 = inlined_call_operand.vmem [shape: f32[8,1], index: 6, kind: input, shape index: {}]   ;;  %s1463_s7 = inlined_call_operand.vmem [shape: f32[1,16], index: 7, kind: input, shape index: {}]   ;;  %s1464_s8 = inlined_call_operand.vmem [shape: f32[1,16], index: 8, kind: input, shape index: {}]   ;;  %s1465_s9 = inlined_call_operand.vmem [shape: bf16[2,16,16], index: 9, kind: input, shape index: {}]   ;;  %s1466_s10 = inlined_call_operand.vmem [shape: f32[2,1,16], index: 10, kind: input, shape index: {}]   ;;  %s1467_s11 = inlined_call_operand.vmem [shape: bf16[2,16,16], index: 11, kind: input, shape index: {}]   ;;  %s1468_s12 = inlined_call_operand.vmem [shape: f32[1,16], index: 12, kind: input, shape index: {}]   ;;  %s1469_s13 = inlined_call_operand.vmem [shape: f32[2,32,16], index: 13, kind: output, shape index: {}]  }
   0x1 LB: > { %s1092_s26 = sadd.s32 4294967295, %s1239_s25   ;;  %p1096_p0 = scmp.ge.s32.totalorder %s1239_s25, 1  ;;  %s1239_s25 = sphi %s1317_s25, %s23_s25  }
   0x2   : > { %p386_p1 = scmp.lt.s32.totalorder %s1239_s25, 3 }
   0x4   : > { %p387_p2 = pnand %p1096_p0, %p386_p1 }
   0x5   : > { %v465_v0 = vld [vmem:[%s1457_s1] sm:$0xff] (!%p387_p2)  ;;  %v1241_v1 = vmov (!%p387_p2), 0   ;;  %v1242_v3 = vmov (!%p387_p2), 0.0   ;;  %vm1243_vm0 = vmmov (!%p387_p2), 0   ;;  %v538_v5 = vld [vmem:[%s1460_s4 + $0x8] sm:$0xff] (!%p387_p2)  ;;  %p429_p3 = scmp.lt.s32.totalorder (!%p387_p2), %s1092_s26, 1 }
   0x6   : > { %390 = sbr.rel (%p387_p2) target bundleno = 1526 (0x5f6), region = 72  ;;  %1196 = vset.pattern.permute.xlu0 (!%p387_p2), %v1241_v1  ;;  %1197 = vset.pattern.permute.xlu1 (!%p387_p2), %v1241_v1  ;;  %v472_v2 = vld [vmem:[%s1458_s2] sm:$0xff] (!%p387_p2)  ;;  %vm442_vm1 = vcmask (!%p387_p2), 523264   ;;  %vm491_vm2 = vcmask (!%p387_p2), 1043456   ;;  %vm487_vm3 = vcmask (!%p387_p2), 64512   ;;  %vm563_vm4 = vcmask (!%p387_p2), 130048  }
   0x7   : > { %468 = vperm.xlu0 (!%p387_p2), %1196, %v465_v0   ;;  %1142 = vmatprep.subr.bf16.mxu1 (!%p387_p2), %v1242_v3  ;;  %v537_v4 = vld [vmem:[%s1460_s4] sm:$0xff] (!%p387_p2)  ;;  %s1245_s17 = smov (!%p387_p2), 112   ;;  %s1246_s18 = smov (!%p387_p2), 80  }
   0x8   : > { %1144 = vmatprep.mubr.msk.bf16.mxu1 (!%p387_p2), %vm1243_vm0, %v1242_v3  ;;  %v539_v6 = vpack.c.bf16 (!%p387_p2), %v538_v5, %v537_v4  ;;  %v557_v7 = vld [vmem:[%s1462_s6] sm:$0xff] (!%p387_p2) }
   0x9   : > { %v1198_v36 = vld [vmem:[%s1459_s3] sm:$0xff] (!%p387_p2)  }
   0xa   : > { %542 = vperm.xlu1 (!%p387_p2), %1197, %v539_v6   ;;  %v556_v54 = vld [vmem:[%s1461_s5] sm:$0xf] (!%p387_p2) }
   0xb   : > { %475 = vperm.xlu0 (!%p387_p2), %1196, %v472_v2  }
   0xd   : > { %s1471_s26 = smov (!%p429_p3, %s1092_s26), 1 }
   0xe   : > { %560 = vperm.xlu1 %1197, %v557_v7   ;;  %s1097_s20 = sshll.u32 %s1471_s26, 3  ;;  %s1125_s30 = sshll.u32 %s1471_s26, 5 }
   0xf   : > { %s432_s23 = scalar_lea.vmem %s1456_s0, %s1097_s20  ;;  %s1363_s16 = scalar_lea.vmem %s1469_s13, %s1125_s30 }
  0x10   : > { %v1347_v8 = vld [vmem:[%s432_s23] sm:$0xff]  ;;  %s1244_s26 = smov 96  }
  0x11   : > { %v443_v9 = vsel %vm442_vm1, %v1347_v8, 0.0 }
  0x12   : > { %v444_v10 = vrot.slane %v443_v9, 4 }
  0x14   : > { %v445_v11 = vadd.f32 %v444_v10, %v443_v9 }
  0x16   : > { %v446_v12 = vrot.slane %v445_v11, 2 }
  0x18   : > { %v447_v13 = vadd.f32 %v446_v12, %v445_v11 }
  0x1a   : > { %v448_v14 = vrot.slane %v447_v13, 1 }
  0x1c   : > { %v449_v15 = vadd.f32 %v448_v14, %v447_v13 }
  0x1e   : > { %v451_v16 = vmul.f32 0.125, %v449_v15 }
  0x20   : > { %v452_v17 = vsub.f32 %v1347_v8, %v451_v16 }
  0x22   : > { %v453_v18 = vmul.f32 %v452_v17, %v452_v17 }
  0x24   : > { %v454_v19 = vsel %vm442_vm1, %v453_v18, 0.0 }
  0x25   : > { %v455_v20 = vrot.slane %v454_v19, 4 }
  0x27   : > { %v456_v21 = vadd.f32 %v455_v20, %v454_v19 }
  0x29   : > { %v457_v22 = vrot.slane %v456_v21, 2 }
  0x2b   : > { %v458_v23 = vadd.f32 %v457_v22, %v456_v21 }
  0x2d   : > { %v459_v24 = vrot.slane %v458_v23, 1 }
  0x2f   : > { %v460_v25 = vadd.f32 %v459_v24, %v458_v23 }
  0x31   : > { %v461_v26 = vmul.f32 0.125, %v460_v25 }
  0x33   : > { %v462_v27 = vadd.f32 1e-05, %v461_v26 }
  0x35   : > { %1203 = vrsqrt.f32 %v462_v27 }
  0x3f   : > { %v1204_v28 = vpop.eup %1203 }
  0x40   : > { %v464_v29 = vmul.f32 %v1204_v28, %v452_v17 }
  0x86   : > { %v469_v30 = vpop.permute.xlu0 %468 }
  0x87   : > { %v471_v31 = vmul.f32 %v469_v30, %v464_v29  ;;  %v1199_v29 = vld [vmem:[%s1465_s9] sm:$0xff]   ;;  %v1200_v30 = vld [vmem:[%s1465_s9 + $0x8] sm:$0xff]  }
  0x88   : > { %1154 = vmatprep.subr.bf16.mxu0 %v1199_v29 }
  0x89   : > { %v543_v42 = vpop.permute.xlu1 %542  ;;  %1155 = vmatpush3.bf16.msra.mxu0 %v1199_v29 }
  0x8a   : > { %v476_v32 = vpop.permute.xlu0 %475 }
  0x8b   : > { %v478_v33 = vadd.f32 %v476_v32, %v471_v31 }
  0x8d   : > { %v481_v34 = vpack.c.bf16 %v478_v33, %v478_v33  ;;  %v561_v55 = vpop.permute.xlu1 %560 }
  0x8f   : > { %v493_v35 = vsel %vm491_vm2, %v481_v34, 0 }
  0x90   : > { %1143 = vmatpush3.bf16.msra.mxu1 %v493_v35 }
  0x91   : > { %1148 = vmatprep.subr.bf16.mxu1 %v1242_v3 }
  0x93   : > { %1145 = vmatmul.mubr.msk.bf16.vlgmr.msra.gmra.mrb[0].mxu1 %vm487_vm3, %v1198_v36 }
  0x94   : > { %1150 = vmatprep.mubr.msk.bf16.mxu1 %vm1243_vm0, %v1242_v3 }
 0x166   : > { %v529_v37 = vpop.f32.mrb[0].mxu1 }
 0x167   : > { %v1146_v38 = vpop.f32.mrb[1].mxu1 }
 0x168   : > { %v532_v39 = vpop.f32.mrb[2].mxu1 }
 0x169   : > { %v536_v40 = vpack.c.bf16 %v532_v39, %v529_v37  ;;  %v1147_v41 = vpop.f32.mrb[3].mxu1 }
 0x16b   : > { %v545_v43 = vadd.bf16 %v543_v42, %v536_v40 }
 0x16d   : > { %v546_v44 = vunpack.c.l.bf16 %v545_v43  ;;  %v547_v45 = vunpack.c.h.bf16 %v545_v43  ;;  %v553_v51 = vmul.bf16 1056980736, %v545_v43 }
 0x16f   : > { %v548_v46 = vmul.f32 0.70710677, %v546_v44  ;;  %v549_v47 = vmul.f32 0.70710677, %v547_v45  ;;  %v1103_v45 = vld [vmem:[%s1463_s7] ss:$0 sm:$0xff] }
 0x171   : > { %1205 = verf.f32 %v548_v46 }
 0x172   : > { %1207 = verf.f32 %v549_v47 }
 0x17b   : > { %v1206_v48 = vpop.eup %1205 }
 0x17c   : > { %v1208_v49 = vpop.eup %1207 }
 0x17d   : > { %v552_v50 = vpack.c.bf16 %v1208_v49, %v1206_v48  ;;  %v1104_v49 = vld [vmem:[%s1464_s8] ss:$0 sm:$0xff] }
 0x17f   : > { %v554_v52 = vadd.bf16 1065369472, %v552_v50 }
 0x181   : > { %v555_v53 = vmul.bf16 %v554_v52, %v553_v51 }
 0x183   : > { %1149 = vmatpush3.bf16.msra.mxu1 %v555_v53 }
 0x184   : > { %1160 = vmatprep.subr.bf16.mxu1 %v1200_v30 }
 0x186   : > { %1151 = vmatmul.mubr.msk.bf16.vlgmr.msra.gmra.mrb[4].mxu1 %vm563_vm4, %v556_v54 }
 0x187   : > { %1161 = vmatpush3.bf16.msra.mxu1 %v1200_v30 }
 0x259   : > { %v601_v56 = vpop.f32.mrb[4].mxu1 }
 0x25a   : > { %v602_v57 = vadd.f32 %v601_v56, %v561_v55  ;;  %v1152_v58 = vpop.f32.mrb[5].mxu1 }
 0x25b   : > { %v604_v59 = vpop.f32.mrb[6].mxu1 }
 0x25c   : > { %v607_v60 = vadd.f32 %v602_v57, %v1347_v8  ;;  %v1153_v61 = vpop.f32.mrb[7].mxu1 }
 0x25e   : > { %608 = vst.msk [vmem:[%s1363_s16] sm:$0xff] %vm563_vm4, %v607_v60  ;;  %614 = vrot.lane.b32.xlu1 %v607_v60, %s1244_s26  ;;  %610 = vrot.lane.b32.xlu0 %v607_v60, %s1245_s17 }
 0x262   : > { %618 = vrot.lane.b32.xlu0 %v607_v60, %s1246_s18 }
 0x265   : > { %v1369_v62 = vld [vmem:[%s1363_s16] sm:$0xff] }
 0x266   : > { %v626_v63 = vsel %vm563_vm4, %v1369_v62, 0.0 }
 0x282   : > { %627 = vadd.xlane.f32.xlu1 %v626_v63 }
 0x2d0   : > { %v615_v0 = vpop.permute.xlu1 %614  ;;  %v611_v1 = vpop.permute.xlu0 %610 }
 0x2d1   : > { %617 = vst.msk [vmem:[%s1363_s16 + $0x10] sm:$0xff] %vm563_vm4, %v615_v0  ;;  %613 = vst.msk [vmem:[%s1363_s16 + $0x8] sm:$0xff] %vm563_vm4, %v611_v1  ;;  %v1201_v0 = vld [vmem:[%s1467_s11 + $0x8] sm:$0xff]   ;;  %v1424_v1 = vld [vmem:[%s1467_s11] sm:$0xff]  }
 0x2d2   : > { %1166 = vmatprep.subr.bf16.mxu0 %v1201_v0 }
 0x2d4   : > { %v619_v2 = vpop.permute.xlu0 %618 }
 0x2d5   : > { %621 = vst.msk [vmem:[%s1363_s16 + $0x18] sm:$0xff] %vm563_vm4, %v619_v2  ;;  %v773_v2 = vlaneseq }
 0x2d8   : > { %v1380_v3 = vld [vmem:[%s1363_s16 + $0x8] sm:$0xff]  ;;  %v1385_v5 = vld [vmem:[%s1363_s16 + $0x10] sm:$0xff] }
 0x2d9   : > { %v629_v4 = vsel %vm563_vm4, %v1380_v3, 0.0  ;;  %v632_v7 = vsel %vm563_vm4, %v1385_v5, 0.0 }
 0x2da   : > { %630 = vadd.xlane.f32.xlu0 %v629_v4  ;;  %v1113_v4 = vld [vmem:[%s1466_s10 + $0x1] sm:$0x1] }
 0x2dc   : > { %v1388_v6 = vld [vmem:[%s1363_s16 + $0x18] sm:$0xff] }
 0x2dd   : > { %v635_v8 = vsel %vm563_vm4, %v1388_v6, 0.0 }
 0x2de   : > { %633 = vadd.xlane.f32.xlu0 %v632_v7  ;;  %636 = vadd.xlane.f32.xlu1 %v635_v8  ;;  %v768_v7 = vld [vmem:[%s1466_s10] sm:$0x1]  ;;  %v774_v8 = vshrl.u32 %v773_v2, 7 }
 0x30f   : > { %v628_v9 = vpop.xlane.xlu1 %627 }
 0x310   : > { %v639_v10 = vmul.f32 0.0625, %v628_v9  ;;  %v863_v9 = vpack.c.bf16 %v1113_v4, %v1113_v4 }
 0x312   : > { %v643_v11 = vsub.f32 %v1369_v62, %v639_v10  ;;  %v769_v10 = vpack.c.bf16 %v768_v7, %v768_v7 }
 0x314   : > { %v647_v12 = vmul.f32 %v643_v11, %v643_v11 }
 0x316   : > { %v651_v13 = vsel %vm563_vm4, %v647_v12, 0.0  ;;  %v865_v12 = vpack.i.b16 %v863_v9, %v863_v9 }
 0x317   : > { %652 = vadd.xlane.f32.xlu0 %v651_v13  ;;  %v771_v13 = vpack.i.b16 %v769_v10, %v769_v10 }
 0x367   : > { %v631_v14 = vpop.xlane.xlu0 %630 }
 0x368   : > { %v640_v15 = vmul.f32 0.0625, %v631_v14 }
 0x36a   : > { %v644_v16 = vsub.f32 %v1380_v3, %v640_v15 }
 0x36b   : > { %v634_v17 = vpop.xlane.xlu0 %633  ;;  %v637_v18 = vpop.xlane.xlu1 %636 }
 0x36c   : > { %v641_v19 = vmul.f32 0.0625, %v634_v17  ;;  %v642_v20 = vmul.f32 0.0625, %v637_v18  ;;  %v648_v21 = vmul.f32 %v644_v16, %v644_v16 }
 0x36e   : > { %v645_v22 = vsub.f32 %v1385_v5, %v641_v19  ;;  %v646_v23 = vsub.f32 %v1388_v6, %v642_v20  ;;  %v654_v24 = vsel %vm563_vm4, %v648_v21, 0.0 }
 0x36f   : > { %655 = vadd.xlane.f32.xlu1 %v654_v24 }
 0x370   : > { %v649_v25 = vmul.f32 %v645_v22, %v645_v22  ;;  %v650_v26 = vmul.f32 %v646_v23, %v646_v23 }
 0x372   : > { %v657_v27 = vsel %vm563_vm4, %v649_v25, 0.0  ;;  %v660_v28 = vsel %vm563_vm4, %v650_v26, 0.0 }
 0x373   : > { %658 = vadd.xlane.f32.xlu0 %v657_v27  ;;  %661 = vadd.xlane.f32.xlu1 %v660_v28 }
 0x3a4   : > { %v653_v31 = vpop.xlane.xlu0 %652 }
 0x3a5   : > { %v663_v32 = vmul.f32 0.0625, %v653_v31 }
 0x3a7   : > { %v667_v33 = vadd.f32 1e-05, %v663_v32 }
 0x3a9   : > { %1209 = vrsqrt.f32 %v667_v33 }
 0x3b3   : > { %v1210_v43 = vpop.eup %1209 }
 0x3b4   : > { %v675_v44 = vmul.f32 %v1210_v43, %v643_v11  ;;  %v775_v11 = vsub.s32 0, %v774_v8 }
 0x3b6   : > { %v686_v48 = vmul.f32 %v1103_v45, %v675_v44  ;;  %v870_v18 = vrot.slane %v865_v12, %v775_v11  ;;  %v776_v20 = vrot.slane %v771_v13, %v775_v11 }
 0x3b8   : > { %v697_v54 = vadd.f32 %v1104_v49, %v686_v48 }
 0x3fc   : > { %v656_v34 = vpop.xlane.xlu1 %655 }
 0x3fd   : > { %v664_v35 = vmul.f32 0.0625, %v656_v34 }
 0x3ff   : > { %v668_v36 = vadd.f32 1e-05, %v664_v35 }
 0x400   : > { %v659_v37 = vpop.xlane.xlu0 %658  ;;  %v662_v38 = vpop.xlane.xlu1 %661 }
 0x401   : > { %1211 = vrsqrt.f32 %v668_v36  ;;  %v665_v39 = vmul.f32 0.0625, %v659_v37  ;;  %v666_v40 = vmul.f32 0.0625, %v662_v38 }
 0x403   : > { %v669_v41 = vadd.f32 1e-05, %v665_v39  ;;  %v670_v42 = vadd.f32 1e-05, %v666_v40 }
 0x405   : > { %1213 = vrsqrt.f32 %v669_v41 }
 0x406   : > { %1215 = vrsqrt.f32 %v670_v42 }
 0x40b   : > { %v1212_v46 = vpop.eup %1211 }
 0x40c   : > { %v676_v47 = vmul.f32 %v1212_v46, %v644_v16 }
 0x40e   : > { %v687_v50 = vmul.f32 %v1103_v45, %v676_v47 }
 0x40f   : > { %v1214_v51 = vpop.eup %1213 }
 0x410   : > { %v1216_v52 = vpop.eup %1215  ;;  %v677_v53 = vmul.f32 %v1214_v51, %v645_v22  ;;  %v698_v55 = vadd.f32 %v1104_v49, %v687_v50 }
 0x411   : > { %v678_v56 = vmul.f32 %v1216_v52, %v646_v23 }
 0x412   : > { %v701_v57 = vpack.c.bf16 %v698_v55, %v697_v54  ;;  %v688_v58 = vmul.f32 %v1103_v45, %v677_v53 }
 0x413   : > { %v689_v59 = vmul.f32 %v1103_v45, %v678_v56 }
 0x414   : > { %1156 = vmatprep.mubr.msk.bf16.mxu0 %vm563_vm4, %v701_v57  ;;  %1162 = vmatprep.mubr.msk.bf16.mxu1 %vm563_vm4, %v701_v57  ;;  %v699_v60 = vadd.f32 %v1104_v49, %v688_v58 }
 0x415   : > { %v700_v61 = vadd.f32 %v1104_v49, %v689_v59 }
 0x417   : > { %v702_v63 = vpack.c.bf16 %v700_v61, %v699_v60 }
 0x419   : > { %1157 = vmatmul.mubr.msk.bf16.vlgmr.msra.gmra.mrb[0].mxu0 %vm563_vm4, %v702_v63  ;;  %1163 = vmatmul.mubr.msk.bf16.vlgmr.msra.gmra.mrb[8].mxu1 %vm563_vm4, %v702_v63 }
 0x41a   : > { %1167 = vmatpush3.bf16.msra.mxu0 %v1201_v0 }
 0x41b   : > { %1172 = vmatprep.subr.bf16.mxu0 %v1424_v1 }
 0x4ec   : > { %v1158_v14 = vpop.f32.mrb[0].mxu0  ;;  %v1164_v15 = vpop.f32.mrb[8].mxu1 }
 0x4ed   : > { %v751_v16 = vpop.f32.mrb[1].mxu0  ;;  %v844_v17 = vpop.f32.mrb[9].mxu1 }
 0x4ee   : > { %v1159_v19 = vpop.f32.mrb[2].mxu0  ;;  %v1165_v21 = vpop.f32.mrb[10].mxu1 }
 0x4ef   : > { %v767_v22 = vpack.c.bf16 %v1159_v19, %v1158_v14  ;;  %v860_v23 = vpack.c.bf16 %v1165_v21, %v1164_v15  ;;  %v754_v24 = vpop.f32.mrb[3].mxu0  ;;  %v847_v25 = vpop.f32.mrb[11].mxu1  ;;  %v1122_v14 = vld [vmem:[%s1468_s12] ss:$0 sm:$0xff] }
 0x4f0   : > { %v766_v26 = vpack.c.bf16 %v754_v24, %v751_v16  ;;  %v859_v27 = vpack.c.bf16 %v847_v25, %v844_v17 }
 0x4f1   : > { %v872_v28 = vadd.bf16 %v870_v18, %v860_v23  ;;  %v778_v40 = vadd.bf16 %v776_v20, %v767_v22 }
 0x4f2   : > { %v777_v29 = vadd.bf16 %v776_v20, %v766_v26  ;;  %v871_v30 = vadd.bf16 %v870_v18, %v859_v27 }
 0x4f3   : > { %v875_v31 = vunpack.c.l.bf16 %v872_v28  ;;  %v876_v32 = vunpack.c.h.bf16 %v872_v28  ;;  %v781_v44 = vunpack.c.l.bf16 %v778_v40  ;;  %v782_v45 = vunpack.c.h.bf16 %v778_v40 }
 0x4f4   : > { %v779_v33 = vunpack.c.l.bf16 %v777_v29  ;;  %v780_v34 = vunpack.c.h.bf16 %v777_v29  ;;  %v873_v36 = vunpack.c.l.bf16 %v871_v30  ;;  %v874_v38 = vunpack.c.h.bf16 %v871_v30 }
 0x4f5   : > { %v879_v35 = vmul.f32 0.70710677, %v875_v31  ;;  %v880_v37 = vmul.f32 0.70710677, %v876_v32  ;;  %v785_v46 = vmul.f32 0.70710677, %v781_v44 }
 0x4f6   : > { %v783_v39 = vmul.f32 0.70710677, %v779_v33  ;;  %v784_v41 = vmul.f32 0.70710677, %v780_v34  ;;  %v877_v42 = vmul.f32 0.70710677, %v873_v36 }
 0x4f7   : > { %1217 = verf.f32 %v879_v35  ;;  %v878_v43 = vmul.f32 0.70710677, %v874_v38  ;;  %v786_v47 = vmul.f32 0.70710677, %v782_v45  ;;  %v887_v58 = vmul.bf16 1056980736, %v871_v30 }
 0x4f8   : > { %1219 = verf.f32 %v880_v37  ;;  %v888_v61 = vmul.bf16 1056980736, %v872_v28  ;;  %v793_v63 = vmul.bf16 1056980736, %v777_v29  ;;  %v794_v11 = vmul.bf16 1056980736, %v778_v40 }
 0x4f9   : > { %1221 = verf.f32 %v783_v39 }
 0x4fa   : > { %1223 = verf.f32 %v784_v41 }
 0x4fb   : > { %1225 = verf.f32 %v877_v42 }
 0x4fc   : > { %1227 = verf.f32 %v878_v43 }
 0x4fd   : > { %1229 = verf.f32 %v785_v46 }
 0x4fe   : > { %1231 = verf.f32 %v786_v47 }
 0x501   : > { %v1218_v48 = vpop.eup %1217 }
 0x502   : > { %v1220_v49 = vpop.eup %1219 }
 0x503   : > { %v1222_v50 = vpop.eup %1221  ;;  %v886_v52 = vpack.c.bf16 %v1220_v49, %v1218_v48 }
 0x504   : > { %v1224_v51 = vpop.eup %1223 }
 0x505   : > { %v1226_v53 = vpop.eup %1225  ;;  %v791_v54 = vpack.c.bf16 %v1224_v51, %v1222_v50  ;;  %v890_v57 = vadd.bf16 1065369472, %v886_v52 }
 0x506   : > { %v1228_v55 = vpop.eup %1227 }
 0x507   : > { %v885_v56 = vpack.c.bf16 %v1228_v55, %v1226_v53  ;;  %v795_v60 = vadd.bf16 1065369472, %v791_v54  ;;  %v1230_v2 = vpop.eup %1229  ;;  %v892_v4 = vmul.bf16 %v890_v57, %v888_v61 }
 0x508   : > { %v1232_v7 = vpop.eup %1231 }
 0x509   : > { %v889_v59 = vadd.bf16 1065369472, %v885_v56  ;;  %v797_v8 = vmul.bf16 %v795_v60, %v793_v63  ;;  %v792_v9 = vpack.c.bf16 %v1232_v7, %v1230_v2 }
 0x50b   : > { %v891_v0 = vmul.bf16 %v889_v59, %v887_v58  ;;  %v796_v10 = vadd.bf16 1065369472, %v792_v9 }
 0x50d   : > { %1168 = vmatprep.mubr.msk.bf16.mxu0 %vm563_vm4, %v891_v0  ;;  %v798_v12 = vmul.bf16 %v796_v10, %v794_v11 }
 0x50e   : > { %1169 = vmatmul.mubr.msk.bf16.vlgmr.msra.gmra.mrb[4].mxu0 %vm563_vm4, %v892_v4 }
 0x50f   : > { %1174 = vmatprep.mubr.msk.bf16.mxu0 %vm563_vm4, %v797_v8  ;;  %1173 = vmatpush3.bf16.msra.mxu0 %v1424_v1 }
 0x51a   : > { %1175 = vmatmul.mubr.msk.bf16.vlgmr.msra.gmra.mrb[4].mxu0 %vm563_vm4, %v798_v12 }
 0x5ed   : > { %v1176_v13 = vpop.f32.mrb[4].mxu0 }
 0x5ee   : > { %v1020_v15 = vadd.f32 %v1176_v13, %v1385_v5  ;;  %v1003_v16 = vpop.f32.mrb[5].mxu0 }
 0x5ef   : > { %v1018_v1 = vadd.f32 %v1003_v16, %v1369_v62  ;;  %v1177_v17 = vpop.f32.mrb[6].mxu0 }
 0x5f0   : > { %v1031_v18 = vadd.f32 %v1122_v14, %v1020_v15  ;;  %v1021_v19 = vadd.f32 %v1177_v17, %v1388_v6  ;;  %v1006_v20 = vpop.f32.mrb[7].mxu0 }
 0x5f1   : > { %v1029_v21 = vadd.f32 %v1122_v14, %v1018_v1  ;;  %v1019_v22 = vadd.f32 %v1006_v20, %v1380_v3 }
 0x5f2   : > { %1035 = vst.msk [vmem:[%s1363_s16 + $0x10] sm:$0xff] %vm563_vm4, %v1031_v18  ;;  %v1032_v23 = vadd.f32 %v1122_v14, %v1021_v19 }
 0x5f3   : > { %1033 = vst.msk [vmem:[%s1363_s16] sm:$0xff] %vm563_vm4, %v1029_v21  ;;  %v1030_v24 = vadd.f32 %v1122_v14, %v1019_v22 }
 0x5f4   : > { %1036 = vst.msk [vmem:[%s1363_s16 + $0x18] sm:$0xff] %vm563_vm4, %v1032_v23 }
 0x5f5   : > { %1034 = vst.msk [vmem:[%s1363_s16 + $0x8] sm:$0xff] %vm563_vm4, %v1030_v24 }
 0x5f6 PF: > { %s23_s25 = sadd.s32 1, %s1239_s25  }
 0x5f7   : > { %p20_p4 = scmp.ge.s32.totalorder %s23_s25, 4  }
 0x5f9   :  { %22 = sbr.rel (!%p20_p4) target bundleno = 1 (0x1), region = 105 }

// kernel: tpu_custom_call.1
= control target key start
LH: loop header
LB: loop body
LE: loop exit
PB: predicated region body
PF: predicated region fallthrough
CT: control target
= control target key end

     0   :  { %s1317_s25 = smov 0   ;;  %s1456_s0 = inlined_call_operand.vmem [shape: f32[2,8,64], index: 0, kind: input, shape index: {}]   ;;  %s1457_s1 = inlined_call_operand.vmem [shape: f32[8,1], index: 1, kind: input, shape index: {}]   ;;  %s1458_s2 = inlined_call_operand.vmem [shape: f32[8,1], index: 2, kind: input, shape index: {}]   ;;  %s1459_s3 = inlined_call_operand.vmem [shape: bf16[16,8], index: 3, kind: input, shape index: {}]   ;;  %s1460_s4 = inlined_call_operand.vmem [shape: f32[16,1], index: 4, kind: input, shape index: {}]   ;;  %s1461_s5 = inlined_call_operand.vmem [shape: bf16[8,16], index: 5, kind: input, shape index: {}]   ;;  %s1462_s6 = inlined_call_operand.vmem [shape: f32[8,1], index: 6, kind: input, shape index: {}]   ;;  %s1463_s7 = inlined_call_operand.vmem [shape: f32[1,16], index: 7, kind: input, shape index: {}]   ;;  %s1464_s8 = inlined_call_operand.vmem [shape: f32[1,16], index: 8, kind: input, shape index: {}]   ;;  %s1465_s9 = inlined_call_operand.vmem [shape: bf16[2,16,16], index: 9, kind: input, shape index: {}]   ;;  %s1466_s10 = inlined_call_operand.vmem [shape: f32[2,1,16], index: 10, kind: input, shape index: {}]   ;;  %s1467_s11 = inlined_call_operand.vmem [shape: bf16[2,16,16], index: 11, kind: input, shape index: {}]   ;;  %s1468_s12 = inlined_call_operand.vmem [shape: f32[1,16], index: 12, kind: input, shape index: {}]   ;;  %s1469_s13 = inlined_call_operand.vmem [shape: f32[2,32,16], index: 13, kind: output, shape index: {}]  }
   0x1 LB: > { %s1092_s26 = sadd.s32 4294967295, %s1239_s25   ;;  %p1096_p0 = scmp.ge.s32.totalorder %s1239_s25, 1  ;;  %s1239_s25 = sphi %s1317_s25, %s23_s25  }
   0x2   : > { %p386_p1 = scmp.lt.s32.totalorder %s1239_s25, 3 }
   0x4   : > { %p387_p2 = pnand %p1096_p0, %p386_p1 }
   0x5   : > { %v465_v0 = vld [vmem:[%s1457_s1] sm:$0xff] (!%p387_p2)  ;;  %v1241_v1 = vmov (!%p387_p2), 0   ;;  %v1242_v3 = vmov (!%p387_p2), 0.0   ;;  %vm1243_vm0 = vmmov (!%p387_p2), 0   ;;  %v538_v5 = vld [vmem:[%s1460_s4 + $0x8] sm:$0xff] (!%p387_p2)  ;;  %p429_p3 = scmp.lt.s32.totalorder (!%p387_p2), %s1092_s26, 1 }
   0x6   : > { %390 = sbr.rel (%p387_p2) target bundleno = 1526 (0x5f6), region = 72  ;;  %1196 = vset.pattern.permute.xlu0 (!%p387_p2), %v1241_v1  ;;  %1197 = vset.pattern.permute.xlu1 (!%p387_p2), %v1241_v1  ;;  %v472_v2 = vld [vmem:[%s1458_s2] sm:$0xff] (!%p387_p2)  ;;  %vm442_vm1 = vcmask (!%p387_p2), 523264   ;;  %vm491_vm2 = vcmask (!%p387_p2), 1043456   ;;  %vm487_vm3 = vcmask (!%p387_p2), 64512   ;;  %vm563_vm4 = vcmask (!%p387_p2), 130048  }
   0x7   : > { %468 = vperm.xlu0 (!%p387_p2), %1196, %v465_v0   ;;  %1142 = vmatprep.subr.bf16.mxu1 (!%p387_p2), %v1242_v3  ;;  %v537_v4 = vld [vmem:[%s1460_s4] sm:$0xff] (!%p387_p2)  ;;  %s1245_s17 = smov (!%p387_p2), 112   ;;  %s1246_s18 = smov (!%p387_p2), 80  }
   0x8   : > { %1144 = vmatprep.mubr.msk.bf16.mxu1 (!%p387_p2), %vm1243_vm0, %v1242_v3  ;;  %v539_v6 = vpack.c.bf16 (!%p387_p2), %v538_v5, %v537_v4  ;;  %v557_v7 = vld [vmem:[%s1462_s6] sm:$0xff] (!%p387_p2) }
   0x9   : > { %v1198_v36 = vld [vmem:[%s1459_s3] sm:$0xff] (!%p387_p2)  }
   0xa   : > { %542 = vperm.xlu1 (!%p387_p2), %1197, %v539_v6   ;;  %v556_v54 = vld [vmem:[%s1461_s5] sm:$0xf] (!%p387_p2) }
   0xb   : > { %475 = vperm.xlu0 (!%p387_p2), %1196, %v472_v2  }
   0xd   : > { %s1471_s26 = smov (!%p429_p3, %s1092_s26), 1 }
   0xe   : > { %560 = vperm.xlu1 %1197, %v557_v7   ;;  %s1097_s20 = sshll.u32 %s1471_s26, 3  ;;  %s1125_s30 = sshll.u32 %s1471_s26, 5 }
   0xf   : > { %s432_s23 = scalar_lea.vmem %s1456_s0, %s1097_s20  ;;  %s1363_s16 = scalar_lea.vmem %s1469_s13, %s1125_s30 }
  0x10   : > { %v1347_v8 = vld [vmem:[%s432_s23] sm:$0xff]  ;;  %s1244_s26 = smov 96  }
  0x11   : > { %v443_v9 = vsel %vm442_vm1, %v1347_v8, 0.0 }
  0x12   : > { %v444_v10 = vrot.slane %v443_v9, 4 }
  0x14   : > { %v445_v11 = vadd.f32 %v444_v10, %v443_v9 }
  0x16   : > { %v446_v12 = vrot.slane %v445_v11, 2 }
  0x18   : > { %v447_v13 = vadd.f32 %v446_v12, %v445_v11 }
  0x1a   : > { %v448_v14 = vrot.slane %v447_v13, 1 }
  0x1c   : > { %v449_v15 = vadd.f32 %v448_v14, %v447_v13 }
  0x1e   : > { %v451_v16 = vmul.f32 0.125, %v449_v15 }
  0x20   : > { %v452_v17 = vsub.f32 %v1347_v8, %v451_v16 }
  0x22   : > { %v453_v18 = vmul.f32 %v452_v17, %v452_v17 }
  0x24   : > { %v454_v19 = vsel %vm442_vm1, %v453_v18, 0.0 }
  0x25   : > { %v455_v20 = vrot.slane %v454_v19, 4 }
  0x27   : > { %v456_v21 = vadd.f32 %v455_v20, %v454_v19 }
  0x29   : > { %v457_v22 = vrot.slane %v456_v21, 2 }
  0x2b   : > { %v458_v23 = vadd.f32 %v457_v22, %v456_v21 }
  0x2d   : > { %v459_v24 = vrot.slane %v458_v23, 1 }
  0x2f   : > { %v460_v25 = vadd.f32 %v459_v24, %v458_v23 }
  0x31   : > { %v461_v26 = vmul.f32 0.125, %v460_v25 }
  0x33   : > { %v462_v27 = vadd.f32 1e-05, %v461_v26 }
  0x35   : > { %1203 = vrsqrt.f32 %v462_v27 }
  0x3f   : > { %v1204_v28 = vpop.eup %1203 }
  0x40   : > { %v464_v29 = vmul.f32 %v1204_v28, %v452_v17 }
  0x86   : > { %v469_v30 = vpop.permute.xlu0 %468 }
  0x87   : > { %v471_v31 = vmul.f32 %v469_v30, %v464_v29  ;;  %v1199_v29 = vld [vmem:[%s1465_s9] sm:$0xff]   ;;  %v1200_v30 = vld [vmem:[%s1465_s9 + $0x8] sm:$0xff]  }
  0x88   : > { %1154 = vmatprep.subr.bf16.mxu0 %v1199_v29 }
  0x89   : > { %v543_v42 = vpop.permute.xlu1 %542  ;;  %1155 = vmatpush3.bf16.msra.mxu0 %v1199_v29 }
  0x8a   : > { %v476_v32 = vpop.permute.xlu0 %475 }
  0x8b   : > { %v478_v33 = vadd.f32 %v476_v32, %v471_v31 }
  0x8d   : > { %v481_v34 = vpack.c.bf16 %v478_v33, %v478_v33  ;;  %v561_v55 = vpop.permute.xlu1 %560 }
  0x8f   : > { %v493_v35 = vsel %vm491_vm2, %v481_v34, 0 }
  0x90   : > { %1143 = vmatpush3.bf16.msra.mxu1 %v493_v35 }
  0x91   : > { %1148 = vmatprep.subr.bf16.mxu1 %v1242_v3 }
  0x93   : > { %1145 = vmatmul.mubr.msk.bf16.vlgmr.msra.gmra.mrb[0].mxu1 %vm487_vm3, %v1198_v36 }
  0x94   : > { %1150 = vmatprep.mubr.msk.bf16.mxu1 %vm1243_vm0, %v1242_v3 }
 0x166   : > { %v529_v37 = vpop.f32.mrb[0].mxu1 }
 0x167   : > { %v1146_v38 = vpop.f32.mrb[1].mxu1 }
 0x168   : > { %v532_v39 = vpop.f32.mrb[2].mxu1 }
 0x169   : > { %v536_v40 = vpack.c.bf16 %v532_v39, %v529_v37  ;;  %v1147_v41 = vpop.f32.mrb[3].mxu1 }
 0x16b   : > { %v545_v43 = vadd.bf16 %v543_v42, %v536_v40 }
 0x16d   : > { %v546_v44 = vunpack.c.l.bf16 %v545_v43  ;;  %v547_v45 = vunpack.c.h.bf16 %v545_v43  ;;  %v553_v51 = vmul.bf16 1056980736, %v545_v43 }
 0x16f   : > { %v548_v46 = vmul.f32 0.70710677, %v546_v44  ;;  %v549_v47 = vmul.f32 0.70710677, %v547_v45  ;;  %v1103_v45 = vld [vmem:[%s1463_s7] ss:$0 sm:$0xff] }
 0x171   : > { %1205 = verf.f32 %v548_v46 }
 0x172   : > { %1207 = verf.f32 %v549_v47 }
 0x17b   : > { %v1206_v48 = vpop.eup %1205 }
 0x17c   : > { %v1208_v49 = vpop.eup %1207 }
 0x17d   : > { %v552_v50 = vpack.c.bf16 %v1208_v49, %v1206_v48  ;;  %v1104_v49 = vld [vmem:[%s1464_s8] ss:$0 sm:$0xff] }
 0x17f   : > { %v554_v52 = vadd.bf16 1065369472, %v552_v50 }
 0x181   : > { %v555_v53 = vmul.bf16 %v554_v52, %v553_v51 }
 0x183   : > { %1149 = vmatpush3.bf16.msra.mxu1 %v555_v53 }
 0x184   : > { %1160 = vmatprep.subr.bf16.mxu1 %v1200_v30 }
 0x186   : > { %1151 = vmatmul.mubr.msk.bf16.vlgmr.msra.gmra.mrb[4].mxu1 %vm563_vm4, %v556_v54 }
 0x187   : > { %1161 = vmatpush3.bf16.msra.mxu1 %v1200_v30 }
 0x259   : > { %v601_v56 = vpop.f32.mrb[4].mxu1 }
 0x25a   : > { %v602_v57 = vadd.f32 %v601_v56, %v561_v55  ;;  %v1152_v58 = vpop.f32.mrb[5].mxu1 }
 0x25b   : > { %v604_v59 = vpop.f32.mrb[6].mxu1 }
 0x25c   : > { %v607_v60 = vadd.f32 %v602_v57, %v1347_v8  ;;  %v1153_v61 = vpop.f32.mrb[7].mxu1 }
 0x25e   : > { %608 = vst.msk [vmem:[%s1363_s16] sm:$0xff] %vm563_vm4, %v607_v60  ;;  %614 = vrot.lane.b32.xlu1 %v607_v60, %s1244_s26  ;;  %610 = vrot.lane.b32.xlu0 %v607_v60, %s1245_s17 }
 0x262   : > { %618 = vrot.lane.b32.xlu0 %v607_v60, %s1246_s18 }
 0x265   : > { %v1369_v62 = vld [vmem:[%s1363_s16] sm:$0xff] }
 0x266   : > { %v626_v63 = vsel %vm563_vm4, %v1369_v62, 0.0 }
 0x282   : > { %627 = vadd.xlane.f32.xlu1 %v626_v63 }
 0x2d0   : > { %v615_v0 = vpop.permute.xlu1 %614  ;;  %v611_v1 = vpop.permute.xlu0 %610 }
 0x2d1   : > { %617 = vst.msk [vmem:[%s1363_s16 + $0x10] sm:$0xff] %vm563_vm4, %v615_v0  ;;  %613 = vst.msk [vmem:[%s1363_s16 + $0x8] sm:$0xff] %vm563_vm4, %v611_v1  ;;  %v1201_v0 = vld [vmem:[%s1467_s11 + $0x8] sm:$0xff]   ;;  %v1424_v1 = vld [vmem:[%s1467_s11] sm:$0xff]  }
 0x2d2   : > { %1166 = vmatprep.subr.bf16.mxu0 %v1201_v0 }
 0x2d4   : > { %v619_v2 = vpop.permute.xlu0 %618 }
 0x2d5   : > { %621 = vst.msk [vmem:[%s1363_s16 + $0x18] sm:$0xff] %vm563_vm4, %v619_v2  ;;  %v773_v2 = vlaneseq }
 0x2d8   : > { %v1380_v3 = vld [vmem:[%s1363_s16 + $0x8] sm:$0xff]  ;;  %v1385_v5 = vld [vmem:[%s1363_s16 + $0x10] sm:$0xff] }
 0x2d9   : > { %v629_v4 = vsel %vm563_vm4, %v1380_v3, 0.0  ;;  %v632_v7 = vsel %vm563_vm4, %v1385_v5, 0.0 }
 0x2da   : > { %630 = vadd.xlane.f32.xlu0 %v629_v4  ;;  %v1113_v4 = vld [vmem:[%s1466_s10 + $0x1] sm:$0x1] }
 0x2dc   : > { %v1388_v6 = vld [vmem:[%s1363_s16 + $0x18] sm:$0xff] }
 0x2dd   : > { %v635_v8 = vsel %vm563_vm4, %v1388_v6, 0.0 }
 0x2de   : > { %633 = vadd.xlane.f32.xlu0 %v632_v7  ;;  %636 = vadd.xlane.f32.xlu1 %v635_v8  ;;  %v768_v7 = vld [vmem:[%s1466_s10] sm:$0x1]  ;;  %v774_v8 = vshrl.u32 %v773_v2, 7 }
 0x30f   : > { %v628_v9 = vpop.xlane.xlu1 %627 }
 0x310   : > { %v639_v10 = vmul.f32 0.0625, %v628_v9  ;;  %v863_v9 = vpack.c.bf16 %v1113_v4, %v1113_v4 }
 0x312   : > { %v643_v11 = vsub.f32 %v1369_v62, %v639_v10  ;;  %v769_v10 = vpack.c.bf16 %v768_v7, %v768_v7 }
 0x314   : > { %v647_v12 = vmul.f32 %v643_v11, %v643_v11 }
 0x316   : > { %v651_v13 = vsel %vm563_vm4, %v647_v12, 0.0  ;;  %v865_v12 = vpack.i.b16 %v863_v9, %v863_v9 }
 0x317   : > { %652 = vadd.xlane.f32.xlu0 %v651_v13  ;;  %v771_v13 = vpack.i.b16 %v769_v10, %v769_v10 }
 0x367   : > { %v631_v14 = vpop.xlane.xlu0 %630 }
 0x368   : > { %v640_v15 = vmul.f32 0.0625, %v631_v14 }
 0x36a   : > { %v644_v16 = vsub.f32 %v1380_v3, %v640_v15 }
 0x36b   : > { %v634_v17 = vpop.xlane.xlu0 %633  ;;  %v637_v18 = vpop.xlane.xlu1 %636 }
 0x36c   : > { %v641_v19 = vmul.f32 0.0625, %v634_v17  ;;  %v642_v20 = vmul.f32 0.0625, %v637_v18  ;;  %v648_v21 = vmul.f32 %v644_v16, %v644_v16 }
 0x36e   : > { %v645_v22 = vsub.f32 %v1385_v5, %v641_v19  ;;  %v646_v23 = vsub.f32 %v1388_v6, %v642_v20  ;;  %v654_v24 = vsel %vm563_vm4, %v648_v21, 0.0 }
 0x36f   : > { %655 = vadd.xlane.f32.xlu1 %v654_v24 }
 0x370   : > { %v649_v25 = vmul.f32 %v645_v22, %v645_v22  ;;  %v650_v26 = vmul.f32 %v646_v23, %v646_v23 }
 0x372   : > { %v657_v27 = vsel %vm563_vm4, %v649_v25, 0.0  ;;  %v660_v28 = vsel %vm563_vm4, %v650_v26, 0.0 }
 0x373   : > { %658 = vadd.xlane.f32.xlu0 %v657_v27  ;;  %661 = vadd.xlane.f32.xlu1 %v660_v28 }
 0x3a4   : > { %v653_v31 = vpop.xlane.xlu0 %652 }
 0x3a5   : > { %v663_v32 = vmul.f32 0.0625, %v653_v31 }
 0x3a7   : > { %v667_v33 = vadd.f32 1e-05, %v663_v32 }
 0x3a9   : > { %1209 = vrsqrt.f32 %v667_v33 }
 0x3b3   : > { %v1210_v43 = vpop.eup %1209 }
 0x3b4   : > { %v675_v44 = vmul.f32 %v1210_v43, %v643_v11  ;;  %v775_v11 = vsub.s32 0, %v774_v8 }
 0x3b6   : > { %v686_v48 = vmul.f32 %v1103_v45, %v675_v44  ;;  %v870_v18 = vrot.slane %v865_v12, %v775_v11  ;;  %v776_v20 = vrot.slane %v771_v13, %v775_v11 }
 0x3b8   : > { %v697_v54 = vadd.f32 %v1104_v49, %v686_v48 }
 0x3fc   : > { %v656_v34 = vpop.xlane.xlu1 %655 }
 0x3fd   : > { %v664_v35 = vmul.f32 0.0625, %v656_v34 }
 0x3ff   : > { %v668_v36 = vadd.f32 1e-05, %v664_v35 }
 0x400   : > { %v659_v37 = vpop.xlane.xlu0 %658  ;;  %v662_v38 = vpop.xlane.xlu1 %661 }
 0x401   : > { %1211 = vrsqrt.f32 %v668_v36  ;;  %v665_v39 = vmul.f32 0.0625, %v659_v37  ;;  %v666_v40 = vmul.f32 0.0625, %v662_v38 }
 0x403   : > { %v669_v41 = vadd.f32 1e-05, %v665_v39  ;;  %v670_v42 = vadd.f32 1e-05, %v666_v40 }
 0x405   : > { %1213 = vrsqrt.f32 %v669_v41 }
 0x406   : > { %1215 = vrsqrt.f32 %v670_v42 }
 0x40b   : > { %v1212_v46 = vpop.eup %1211 }
 0x40c   : > { %v676_v47 = vmul.f32 %v1212_v46, %v644_v16 }
 0x40e   : > { %v687_v50 = vmul.f32 %v1103_v45, %v676_v47 }
 0x40f   : > { %v1214_v51 = vpop.eup %1213 }
 0x410   : > { %v1216_v52 = vpop.eup %1215  ;;  %v677_v53 = vmul.f32 %v1214_v51, %v645_v22  ;;  %v698_v55 = vadd.f32 %v1104_v49, %v687_v50 }
 0x411   : > { %v678_v56 = vmul.f32 %v1216_v52, %v646_v23 }
 0x412   : > { %v701_v57 = vpack.c.bf16 %v698_v55, %v697_v54  ;;  %v688_v58 = vmul.f32 %v1103_v45, %v677_v53 }
 0x413   : > { %v689_v59 = vmul.f32 %v1103_v45, %v678_v56 }
 0x414   : > { %1156 = vmatprep.mubr.msk.bf16.mxu0 %vm563_vm4, %v701_v57  ;;  %1162 = vmatprep.mubr.msk.bf16.mxu1 %vm563_vm4, %v701_v57  ;;  %v699_v60 = vadd.f32 %v1104_v49, %v688_v58 }
 0x415   : > { %v700_v61 = vadd.f32 %v1104_v49, %v689_v59 }
 0x417   : > { %v702_v63 = vpack.c.bf16 %v700_v61, %v699_v60 }
 0x419   : > { %1157 = vmatmul.mubr.msk.bf16.vlgmr.msra.gmra.mrb[0].mxu0 %vm563_vm4, %v702_v63  ;;  %1163 = vmatmul.mubr.msk.bf16.vlgmr.msra.gmra.mrb[8].mxu1 %vm563_vm4, %v702_v63 }
 0x41a   : > { %1167 = vmatpush3.bf16.msra.mxu0 %v1201_v0 }
 0x41b   : > { %1172 = vmatprep.subr.bf16.mxu0 %v1424_v1 }
 0x4ec   : > { %v1158_v14 = vpop.f32.mrb[0].mxu0  ;;  %v1164_v15 = vpop.f32.mrb[8].mxu1 }
 0x4ed   : > { %v751_v16 = vpop.f32.mrb[1].mxu0  ;;  %v844_v17 = vpop.f32.mrb[9].mxu1 }
 0x4ee   : > { %v1159_v19 = vpop.f32.mrb[2].mxu0  ;;  %v1165_v21 = vpop.f32.mrb[10].mxu1 }
 0x4ef   : > { %v767_v22 = vpack.c.bf16 %v1159_v19, %v1158_v14  ;;  %v860_v23 = vpack.c.bf16 %v1165_v21, %v1164_v15  ;;  %v754_v24 = vpop.f32.mrb[3].mxu0  ;;  %v847_v25 = vpop.f32.mrb[11].mxu1  ;;  %v1122_v14 = vld [vmem:[%s1468_s12] ss:$0 sm:$0xff] }
 0x4f0   : > { %v766_v26 = vpack.c.bf16 %v754_v24, %v751_v16  ;;  %v859_v27 = vpack.c.bf16 %v847_v25, %v844_v17 }
 0x4f1   : > { %v872_v28 = vadd.bf16 %v870_v18, %v860_v23  ;;  %v778_v40 = vadd.bf16 %v776_v20, %v767_v22 }
 0x4f2   : > { %v777_v29 = vadd.bf16 %v776_v20, %v766_v26  ;;  %v871_v30 = vadd.bf16 %v870_v18, %v859_v27 }
 0x4f3   : > { %v875_v31 = vunpack.c.l.bf16 %v872_v28  ;;  %v876_v32 = vunpack.c.h.bf16 %v872_v28  ;;  %v781_v44 = vunpack.c.l.bf16 %v778_v40  ;;  %v782_v45 = vunpack.c.h.bf16 %v778_v40 }
 0x4f4   : > { %v779_v33 = vunpack.c.l.bf16 %v777_v29  ;;  %v780_v34 = vunpack.c.h.bf16 %v777_v29  ;;  %v873_v36 = vunpack.c.l.bf16 %v871_v30  ;;  %v874_v38 = vunpack.c.h.bf16 %v871_v30 }
 0x4f5   : > { %v879_v35 = vmul.f32 0.70710677, %v875_v31  ;;  %v880_v37 = vmul.f32 0.70710677, %v876_v32  ;;  %v785_v46 = vmul.f32 0.70710677, %v781_v44 }
 0x4f6   : > { %v783_v39 = vmul.f32 0.70710677, %v779_v33  ;;  %v784_v41 = vmul.f32 0.70710677, %v780_v34  ;;  %v877_v42 = vmul.f32 0.70710677, %v873_v36 }
 0x4f7   : > { %1217 = verf.f32 %v879_v35  ;;  %v878_v43 = vmul.f32 0.70710677, %v874_v38  ;;  %v786_v47 = vmul.f32 0.70710677, %v782_v45  ;;  %v887_v58 = vmul.bf16 1056980736, %v871_v30 }
 0x4f8   : > { %1219 = verf.f32 %v880_v37  ;;  %v888_v61 = vmul.bf16 1056980736, %v872_v28  ;;  %v793_v63 = vmul.bf16 1056980736, %v777_v29  ;;  %v794_v11 = vmul.bf16 1056980736, %v778_v40 }
 0x4f9   : > { %1221 = verf.f32 %v783_v39 }
 0x4fa   : > { %1223 = verf.f32 %v784_v41 }
 0x4fb   : > { %1225 = verf.f32 %v877_v42 }
 0x4fc   : > { %1227 = verf.f32 %v878_v43 }
 0x4fd   : > { %1229 = verf.f32 %v785_v46 }
 0x4fe   : > { %1231 = verf.f32 %v786_v47 }
 0x501   : > { %v1218_v48 = vpop.eup %1217 }
 0x502   : > { %v1220_v49 = vpop.eup %1219 }
 0x503   : > { %v1222_v50 = vpop.eup %1221  ;;  %v886_v52 = vpack.c.bf16 %v1220_v49, %v1218_v48 }
 0x504   : > { %v1224_v51 = vpop.eup %1223 }
 0x505   : > { %v1226_v53 = vpop.eup %1225  ;;  %v791_v54 = vpack.c.bf16 %v1224_v51, %v1222_v50  ;;  %v890_v57 = vadd.bf16 1065369472, %v886_v52 }
 0x506   : > { %v1228_v55 = vpop.eup %1227 }
 0x507   : > { %v885_v56 = vpack.c.bf16 %v1228_v55, %v1226_v53  ;;  %v795_v60 = vadd.bf16 1065369472, %v791_v54  ;;  %v1230_v2 = vpop.eup %1229  ;;  %v892_v4 = vmul.bf16 %v890_v57, %v888_v61 }
 0x508   : > { %v1232_v7 = vpop.eup %1231 }
 0x509   : > { %v889_v59 = vadd.bf16 1065369472, %v885_v56  ;;  %v797_v8 = vmul.bf16 %v795_v60, %v793_v63  ;;  %v792_v9 = vpack.c.bf16 %v1232_v7, %v1230_v2 }
 0x50b   : > { %v891_v0 = vmul.bf16 %v889_v59, %v887_v58  ;;  %v796_v10 = vadd.bf16 1065369472, %v792_v9 }
 0x50d   : > { %1168 = vmatprep.mubr.msk.bf16.mxu0 %vm563_vm4, %v891_v0  ;;  %v798_v12 = vmul.bf16 %v796_v10, %v794_v11 }
 0x50e   : > { %1169 = vmatmul.mubr.msk.bf16.vlgmr.msra.gmra.mrb[4].mxu0 %vm563_vm4, %v892_v4 }
 0x50f   : > { %1174 = vmatprep.mubr.msk.bf16.mxu0 %vm563_vm4, %v797_v8  ;;  %1173 = vmatpush3.bf16.msra.mxu0 %v1424_v1 }
 0x51a   : > { %1175 = vmatmul.mubr.msk.bf16.vlgmr.msra.gmra.mrb[4].mxu0 %vm563_vm4, %v798_v12 }
 0x5ed   : > { %v1176_v13 = vpop.f32.mrb[4].mxu0 }
 0x5ee   : > { %v1020_v15 = vadd.f32 %v1176_v13, %v1385_v5  ;;  %v1003_v16 = vpop.f32.mrb[5].mxu0 }
 0x5ef   : > { %v1018_v1 = vadd.f32 %v1003_v16, %v1369_v62  ;;  %v1177_v17 = vpop.f32.mrb[6].mxu0 }
 0x5f0   : > { %v1031_v18 = vadd.f32 %v1122_v14, %v1020_v15  ;;  %v1021_v19 = vadd.f32 %v1177_v17, %v1388_v6  ;;  %v1006_v20 = vpop.f32.mrb[7].mxu0 }
 0x5f1   : > { %v1029_v21 = vadd.f32 %v1122_v14, %v1018_v1  ;;  %v1019_v22 = vadd.f32 %v1006_v20, %v1380_v3 }
 0x5f2   : > { %1035 = vst.msk [vmem:[%s1363_s16 + $0x10] sm:$0xff] %vm563_vm4, %v1031_v18  ;;  %v1032_v23 = vadd.f32 %v1122_v14, %v1021_v19 }
 0x5f3   : > { %1033 = vst.msk [vmem:[%s1363_s16] sm:$0xff] %vm563_vm4, %v1029_v21  ;;  %v1030_v24 = vadd.f32 %v1122_v14, %v1019_v22 }
 0x5f4   : > { %1036 = vst.msk [vmem:[%s1363_s16 + $0x18] sm:$0xff] %vm563_vm4, %v1032_v23 }
 0x5f5   : > { %1034 = vst.msk [vmem:[%s1363_s16 + $0x8] sm:$0xff] %vm563_vm4, %v1030_v24 }
 0x5f6 PF: > { %s23_s25 = sadd.s32 1, %s1239_s25  }
 0x5f7   : > { %p20_p4 = scmp.ge.s32.totalorder %s23_s25, 4  }
 0x5f9   :  { %22 = sbr.rel (!%p20_p4) target bundleno = 1 (0x1), region = 105 }

</bundles_post_ra>
